<compile_context>
chip_gen: v7x
topology: tpu7x:2x2x1
jax: 0.10.0
libtpu: 0.0.40
codegen_flags: <defaults>
</compile_context>

<pallas_src>
import math
import functools

import jax
import jax.numpy as jnp
from jax.experimental import pallas as pl
from jax.experimental.pallas import tpu as pltpu


def _layer_norm(x, gamma, beta, eps=1e-5):
    # f32 elementwise math (v5e has no bf16 VPU path)
    mean = jnp.mean(x, axis=-1, keepdims=True)
    var = jnp.mean((x - mean) ** 2, axis=-1, keepdims=True)
    return (x - mean) * jax.lax.rsqrt(var + eps) * gamma + beta


def encoder_block_kernel(x_ref,                               # (TB, S, D) bf16
                         vl_ref,                              # (B, 1) int32, resident
                         wqkv_ref, bqkv_ref,                  # fused QKV (D, 3D) bf16 / (1, 3D) f32
                         wo_ref, bo_ref,                      # (D, D) bf16 / (1, D) f32
                         g1_ref, beta1_ref,                   # LayerNorm 1
                         w1_ref, b1_ref, w2_ref, b2_ref,      # FFN weights
                         g2_ref, beta2_ref,                   # LayerNorm 2
                         out_ref,                             # (TB, S, D) f32
                         ctx_ref,                             # scratch: (TB, S, D) bf16
                         *, num_heads, bf16_exp):
    TB, S, D = x_ref.shape
    H = num_heads
    hd = D // H
    M = TB * S

    x_bf = x_ref[...].reshape(M, D)                           # bf16 row slab
    x32 = x_bf.astype(jnp.float32)                            # f32 residual copy

    # ---- fused QKV projection: one full-width MXU matmul (scale pre-folded) ----
    qkv = (jnp.dot(x_bf, wqkv_ref[...], preferred_element_type=jnp.float32)
           + bqkv_ref[...])                                   # (M, 3D) f32
    q3 = qkv[:, :D].astype(jnp.bfloat16).reshape(TB, S, D)
    k3 = qkv[:, D:2 * D].astype(jnp.bfloat16).reshape(TB, S, D)
    v3 = qkv[:, 2 * D:].astype(jnp.bfloat16).reshape(TB, S, D)

    # ---- key-padding mask: inline compare, no (TB,S,S) bias materialized ----
    b0 = pl.multiple_of(pl.program_id(0) * TB, TB)
    vlen = vl_ref[pl.ds(b0, TB), :].reshape(TB, 1, 1)         # int32
    col = jax.lax.broadcasted_iota(jnp.int32, (TB, 1, S), 2)
    kmask = col < vlen                                        # (TB, 1, S) bool

    # ---- multi-head attention: per-head batched einsums, ctx -> lane slot ----
    for h in range(H):                                        # H static & small
        lo = h * hd
        qh = q3[:, :, lo:lo + hd]
        kh = k3[:, :, lo:lo + hd]
        vh = v3[:, :, lo:lo + hd]
        s = jnp.einsum('bqd,bkd->bqk', qh, kh,
                       preferred_element_type=jnp.float32)    # (TB, S, S) f32
        s = jnp.where(kmask, s, -1e6)
        s = s - jnp.max(s, axis=-1, keepdims=True)
        if bf16_exp:                                          # v6e/v7x bf16 EUP path
            p = jnp.exp(s.astype(jnp.bfloat16))
            denom = jnp.sum(p.astype(jnp.float32), axis=-1, keepdims=True)
        else:                                                 # v5e and older: f32 exp
            p32 = jnp.exp(s)
            denom = jnp.sum(p32, axis=-1, keepdims=True)
            p = p32.astype(jnp.bfloat16)
        inv = pl.reciprocal(denom, approx=True)               # EUP slot
        ctx = jnp.einsum('bqk,bkd->bqd', p, vh,
                         preferred_element_type=jnp.float32)  # (TB, S, hd)
        # normalize after the PV matmul (hd columns < S columns) and park the
        # head in its lane slot; the masked vst hides under the MXU.
        ctx_ref[:, :, lo:lo + hd] = (ctx * inv).astype(jnp.bfloat16)

    # ---- single full-D output projection with the un-split Wo ----
    attn = (jnp.dot(ctx_ref[...].reshape(M, D), wo_ref[...],
                    preferred_element_type=jnp.float32) + bo_ref[...])

    # ---- AddNorm 1 (dropout = identity in eval mode) ----
    y = _layer_norm(x32 + attn, g1_ref[...], beta1_ref[...])

    # ---- position-wise FFN (bf16 matmuls, f32 accumulation / bias / relu) ----
    h1 = (jnp.dot(y.astype(jnp.bfloat16), w1_ref[...],
                  preferred_element_type=jnp.float32) + b1_ref[...])
    h1_bf = jnp.maximum(h1, 0.0).astype(jnp.bfloat16)         # f32 hidden dies here
    f = (jnp.dot(h1_bf, w2_ref[...],
                 preferred_element_type=jnp.float32) + b2_ref[...])

    # ---- AddNorm 2 ----
    out_ref[...] = _layer_norm(y + f, g2_ref[...], beta2_ref[...]).reshape(TB, S, D)


def encoder_block(x, valid_lens, params, num_heads, block_batch=None):
    """x: (B, S, D) float, valid_lens: (B,) int32."""
    B, S, D = x.shape
    assert D % num_heads == 0
    hd = D // num_heads
    F = params["w1"].shape[1]
    scale = 1.0 / math.sqrt(hd)
    bf = jnp.bfloat16

    # one-time weight prep (XLA ops outside the kernel):
    #   * Wq/Wk/Wv fused into a single (D, 3D) weight, 1/sqrt(hd) folded into Wq/bq
    #   * all matmul weights cast to bf16; Wo kept un-split for one full-D matmul
    wqkv = jnp.concatenate(
        [params["wq"] * scale, params["wk"], params["wv"]], axis=1).astype(bf)
    bqkv = jnp.concatenate(
        [params["bq"] * scale, params["bk"], params["bv"]], axis=1).astype(jnp.float32)
    weight_list = [
        wqkv, bqkv,
        params["wo"].astype(bf), params["bo"],
        params["g1"], params["beta1"],
        params["w1"].astype(bf), params["b1"],
        params["w2"].astype(bf), params["b2"],
        params["g2"], params["beta2"],
    ]
    weight_bytes = sum(int(w.size) * w.dtype.itemsize for w in weight_list)

    # ---- generation-aware VMEM budget (v5e/v6e: 128 MiB, v7x: 64 MiB per TC) ----
    try:
        phys_vmem = int(pltpu.get_tpu_info().vmem_capacity_bytes)
    except Exception:
        phys_vmem = 64 << 20
    vmem_cap = max(phys_vmem - (6 << 20), 16 << 20)           # leave DMA headroom

    def vmem_estimate(tb):
        m = tb * S
        return (2 * (tb * S * D * 2 + tb * S * D * 4)   # double-buffered x(bf16)+out(f32)
                + weight_bytes                           # single-buffered resident weights
                + m * 3 * D * 2                          # bf16 q/k/v
                + m * D * 2                              # ctx scratch (bf16)
                + tb * S * S * 6                         # scores f32 + probs bf16 (1 head)
                + m * F * 6                              # FFN hidden (f32 transient + bf16)
                + 3 * m * D * 4)                         # f32 residual / LayerNorm slabs

    # ---- block-batch: maximize the MXU M dimension under the VMEM budget ----
    if block_batch is None:
        divisors = [d for d in range(1, B + 1) if B % d == 0]
        fitting = [d for d in divisors if vmem_estimate(d) <= 0.8 * vmem_cap]
        tb = max(fitting) if fitting else min(divisors)
        # keep a >=2-block grid (two v7x TensorCores) only if it does not shrink
        # the matmul M dimension below ~256 rows
        if B // tb == 1:
            for d in sorted(divisors, reverse=True):
                if d < tb and d * S >= 256 and vmem_estimate(d) <= 0.8 * vmem_cap:
                    tb = d
                    break
        block_batch = tb
    TB = block_batch
    assert B % TB == 0
    num_blocks = B // TB

    # bf16 exp is only native on the v6e+ EUP; keep f32 exp on <= v5
    try:
        kind = jax.devices()[0].device_kind.lower()
    except Exception:
        kind = ""
    bf16_exp = not any(v in kind for v in ("v2", "v3", "v4", "v5"))

    buffered_ok = hasattr(pl, "Buffered")

    def resident_spec(shape):
        ndim = len(shape)
        imap = lambda i, _n=ndim: (0,) * _n
        if buffered_ok:
            try:   # single-buffer constant-index (resident) blocks -> reclaim VMEM
                return pl.BlockSpec(shape, imap, pipeline_mode=pl.Buffered(1))
            except Exception:
                pass
        return pl.BlockSpec(shape, imap)

    x_bf16 = x.astype(jnp.bfloat16)                 # halves activation HBM/VMEM
    vl2 = valid_lens.reshape(B, 1).astype(jnp.int32)

    in_specs = [pl.BlockSpec((TB, S, D), lambda i: (i, 0, 0)),     # x (batch-blocked)
                resident_spec((B, 1))]                             # valid_lens
    in_specs += [resident_spec(w.shape) for w in weight_list]
    out_specs = pl.BlockSpec((TB, S, D), lambda i: (i, 0, 0))

    vmem_limit = int(min(max(2 * vmem_estimate(TB), 32 << 20), vmem_cap))

    grid_spec = pltpu.PrefetchScalarGridSpec(
        num_scalar_prefetch=0,
        grid=(num_blocks,),
        in_specs=in_specs,
        out_specs=out_specs,
        scratch_shapes=[pltpu.VMEM((TB, S, D), jnp.bfloat16)],     # per-head ctx slots
    )

    kernel = functools.partial(encoder_block_kernel,
                               num_heads=num_heads, bf16_exp=bf16_exp)

    return pl.pallas_call(
        kernel,
        out_shape=jax.ShapeDtypeStruct((B, S, D), jnp.float32),
        grid_spec=grid_spec,
        compiler_params=pltpu.CompilerParams(
            dimension_semantics=("parallel",),
            vmem_limit_bytes=vmem_limit),
    )(x_bf16, vl2, *weight_list)


def encoder_block_reference(x, valid_lens, params, num_heads):
    """Pure-JAX f32 reference matching the PyTorch EncoderBlock (eval mode)."""
    B, S, D = x.shape
    hd = D // num_heads

    def dense(v, w, b):
        return v @ w + b

    def split(t):  # (B, S, D) -> (B, H, S, hd)
        return t.reshape(B, S, num_heads, hd).transpose(0, 2, 1, 3)

    q, k, v = (dense(x, params["wq"], params["bq"]),
               dense(x, params["wk"], params["bk"]),
               dense(x, params["wv"], params["bv"]))
    qh, kh, vh = split(q), split(k), split(v)
    s = jnp.einsum('bhqd,bhkd->bhqk', qh, kh) / math.sqrt(hd)
    mask = jnp.arange(S)[None, None, None, :] < valid_lens[:, None, None, None]
    s = jnp.where(mask, s, -1e6)
    p = jax.nn.softmax(s, axis=-1)
    ctx = jnp.einsum('bhqk,bhkd->bhqd', p, vh).transpose(0, 2, 1, 3).reshape(B, S, D)
    attn = dense(ctx, params["wo"], params["bo"])

    def ln(t, g, b):
        m = t.mean(-1, keepdims=True)
        var = ((t - m) ** 2).mean(-1, keepdims=True)
        return (t - m) / jnp.sqrt(var + 1e-5) * g + b

    y = ln(x + attn, params["g1"], params["beta1"])
    h = jnp.maximum(dense(y, params["w1"], params["b1"]), 0.0)
    f = dense(h, params["w2"], params["b2"])
    return ln(y + f, params["g2"], params["beta2"])


def init_params(key, num_hiddens, ffn_hiddens, scale=0.1):
    ks = jax.random.split(key, 8)
    D, Hf = num_hiddens, ffn_hiddens
    return {
        # attention projections, stored (in, out) — equivalent to nn.Linear
        "wq": scale * jax.random.normal(ks[0], (D, D), jnp.float32),
        "bq": jnp.zeros((1, D), jnp.float32),
        "wk": scale * jax.random.normal(ks[1], (D, D), jnp.float32),
        "bk": jnp.zeros((1, D), jnp.float32),
        "wv": scale * jax.random.normal(ks[2], (D, D), jnp.float32),
        "bv": jnp.zeros((1, D), jnp.float32),
        "wo": scale * jax.random.normal(ks[3], (D, D), jnp.float32),
        "bo": jnp.zeros((1, D), jnp.float32),
        # LayerNorm 1
        "g1": jnp.ones((1, D), jnp.float32),
        "beta1": jnp.zeros((1, D), jnp.float32),
        # FFN
        "w1": scale * jax.random.normal(ks[4], (D, Hf), jnp.float32),
        "b1": 0.01 * jnp.ones((1, Hf), jnp.float32),
        "w2": scale * jax.random.normal(ks[5], (Hf, D), jnp.float32),
        "b2": 0.01 * jnp.ones((1, D), jnp.float32),
        # LayerNorm 2
        "g2": jnp.ones((1, D), jnp.float32),
        "beta2": jnp.zeros((1, D), jnp.float32),
    }


if __name__ == "__main__":
    B, S, D = 4, 8, 128         # batch, seq, num_hiddens (D lane-dense)
    HEADS = 4                   # head_dim = 32
    FFN_H = 256                 # FFN hidden size

    key = jax.random.PRNGKey(0)
    k_x, k_p = jax.random.split(key)

    x = jax.random.normal(k_x, (B, S, D), dtype=jnp.float32)
    valid_lens = jnp.array([3, 8, 5, 8], dtype=jnp.int32)
    params = init_params(k_p, D, FFN_H)

    out = encoder_block(x, valid_lens, params, HEADS)
    jax.block_until_ready(out)

    assert out.shape == (B, S, D)
    assert bool(jnp.all(jnp.isfinite(out)))

    ref = encoder_block_reference(x, valid_lens, params, HEADS)
    max_err = float(jnp.max(jnp.abs(out - ref)))
    assert max_err < 1e-1, f"mismatch vs reference: {max_err}"

    print("KERNEL_OK")
</pallas_src>

<mosaic_0001>
module attributes {stable_mosaic.version = 11 : i64} {
  func.func @encoder_block_kernel(%arg0: i32, %arg1: memref<4x8x128xbf16, #tpu.memory_space<vmem>>, %arg2: memref<4x1xi32, #tpu.memory_space<vmem>>, %arg3: memref<128x384xbf16, #tpu.memory_space<vmem>>, %arg4: memref<1x384xf32, #tpu.memory_space<vmem>>, %arg5: memref<128x128xbf16, #tpu.memory_space<vmem>>, %arg6: memref<1x128xf32, #tpu.memory_space<vmem>>, %arg7: memref<1x128xf32, #tpu.memory_space<vmem>>, %arg8: memref<1x128xf32, #tpu.memory_space<vmem>>, %arg9: memref<128x256xbf16, #tpu.memory_space<vmem>>, %arg10: memref<1x256xf32, #tpu.memory_space<vmem>>, %arg11: memref<256x128xbf16, #tpu.memory_space<vmem>>, %arg12: memref<1x128xf32, #tpu.memory_space<vmem>>, %arg13: memref<1x128xf32, #tpu.memory_space<vmem>>, %arg14: memref<1x128xf32, #tpu.memory_space<vmem>>, %arg15: memref<4x8x128xf32, #tpu.memory_space<vmem>>, %arg16: memref<4x8x128xbf16, #tpu.memory_space<vmem>>) attributes {dimension_semantics = [#tpu.dimension_semantics<parallel>], iteration_bounds = array<i64: 1>, scalar_prefetch = 0 : i64, scratch_operands = 1 : i64, tpu.core_type = #tpu.core_type<tc>, window_params = [{transform_indices = @transform_0, window_bounds = array<i64: 4, 8, 128>}, {pipeline_mode = #tpu.pipeline_mode<synchronous>, transform_indices = @transform_1, window_bounds = array<i64: 4, 1>}, {pipeline_mode = #tpu.pipeline_mode<synchronous>, transform_indices = @transform_2, window_bounds = array<i64: 128, 384>}, {pipeline_mode = #tpu.pipeline_mode<synchronous>, transform_indices = @transform_3, window_bounds = array<i64: 1, 384>}, {pipeline_mode = #tpu.pipeline_mode<synchronous>, transform_indices = @transform_4, window_bounds = array<i64: 128, 128>}, {pipeline_mode = #tpu.pipeline_mode<synchronous>, transform_indices = @transform_5, window_bounds = array<i64: 1, 128>}, {pipeline_mode = #tpu.pipeline_mode<synchronous>, transform_indices = @transform_6, window_bounds = array<i64: 1, 128>}, {pipeline_mode = #tpu.pipeline_mode<synchronous>, transform_indices = @transform_7, window_bounds = array<i64: 1, 128>}, {pipeline_mode = #tpu.pipeline_mode<synchronous>, transform_indices = @transform_8, window_bounds = array<i64: 128, 256>}, {pipeline_mode = #tpu.pipeline_mode<synchronous>, transform_indices = @transform_9, window_bounds = array<i64: 1, 256>}, {pipeline_mode = #tpu.pipeline_mode<synchronous>, transform_indices = @transform_10, window_bounds = array<i64: 256, 128>}, {pipeline_mode = #tpu.pipeline_mode<synchronous>, transform_indices = @transform_11, window_bounds = array<i64: 1, 128>}, {pipeline_mode = #tpu.pipeline_mode<synchronous>, transform_indices = @transform_12, window_bounds = array<i64: 1, 128>}, {pipeline_mode = #tpu.pipeline_mode<synchronous>, transform_indices = @transform_13, window_bounds = array<i64: 1, 128>}, {transform_indices = @transform_14, window_bounds = array<i64: 4, 8, 128>}]} {
    %c0 = arith.constant 0 : index
    %c0_0 = arith.constant 0 : index
    %c0_1 = arith.constant 0 : index
    %0 = vector.load %arg1[%c0, %c0_0, %c0_1] : memref<4x8x128xbf16, #tpu.memory_space<vmem>>, vector<4x8x128xbf16>
    %1 = vector.shape_cast %0 : vector<4x8x128xbf16> to vector<32x128xbf16>
    %2 = arith.extf %1 : vector<32x128xbf16> to vector<32x128xf32>
    %c0_2 = arith.constant 0 : index
    %c0_3 = arith.constant 0 : index
    %3 = vector.load %arg3[%c0_2, %c0_3] : memref<128x384xbf16, #tpu.memory_space<vmem>>, vector<128x384xbf16>
    %cst = arith.constant dense<0.000000e+00> : vector<32x384xf32>
    %4 = tpu.matmul %1, %3, %cst {dimension_numbers = #tpu.dot_dimension_numbers<[1], [0], [0], [1], [0, 0, 1, 1], [], []>} : vector<32x128xbf16>, vector<128x384xbf16>, vector<32x384xf32> -> vector<32x384xf32>
    %c0_4 = arith.constant 0 : index
    %c0_5 = arith.constant 0 : index
    %5 = vector.load %arg4[%c0_4, %c0_5] : memref<1x384xf32, #tpu.memory_space<vmem>>, vector<1x384xf32>
    %6 = vector.broadcast %5 : vector<1x384xf32> to vector<32x384xf32>
    %7 = arith.addf %4, %6 : vector<32x384xf32>
    %8 = vector.extract_strided_slice %7 {offsets = [0, 0], sizes = [32, 128], strides = [1, 1]} : vector<32x384xf32> to vector<32x128xf32>
    %9 = arith.truncf %8 : vector<32x128xf32> to vector<32x128xbf16>
    %10 = vector.shape_cast %9 : vector<32x128xbf16> to vector<4x8x128xbf16>
    %11 = vector.extract_strided_slice %7 {offsets = [0, 128], sizes = [32, 128], strides = [1, 1]} : vector<32x384xf32> to vector<32x128xf32>
    %12 = arith.truncf %11 : vector<32x128xf32> to vector<32x128xbf16>
    %13 = vector.shape_cast %12 : vector<32x128xbf16> to vector<4x8x128xbf16>
    %14 = vector.extract_strided_slice %7 {offsets = [0, 256], sizes = [32, 128], strides = [1, 1]} : vector<32x384xf32> to vector<32x128xf32>
    %15 = arith.truncf %14 : vector<32x128xf32> to vector<32x128xbf16>
    %16 = vector.shape_cast %15 : vector<32x128xbf16> to vector<4x8x128xbf16>
    %c4_i32 = arith.constant 4 : i32
    %17 = arith.muli %arg0, %c4_i32 : i32
    %18 = tpu.assume_multiple %17, 4 : i32
    %19 = arith.index_cast %18 : i32 to index
    %c0_6 = arith.constant 0 : index
    %20 = vector.load %arg2[%19, %c0_6] : memref<4x1xi32, #tpu.memory_space<vmem>>, vector<4x1xi32>
    %21 = vector.shape_cast %20 : vector<4x1xi32> to vector<4x1x1xi32>
    %22 = tpu.iota {dimensions = array<i32: 2>} : vector<4x1x8xi32>
    %23 = vector.broadcast %21 : vector<4x1x1xi32> to vector<4x1x8xi32>
    %24 = arith.cmpi slt, %22, %23 : vector<4x1x8xi32>
    %25 = vector.extract_strided_slice %10 {offsets = [0, 0, 0], sizes = [4, 8, 32], strides = [1, 1, 1]} : vector<4x8x128xbf16> to vector<4x8x32xbf16>
    %26 = vector.extract_strided_slice %13 {offsets = [0, 0, 0], sizes = [4, 8, 32], strides = [1, 1, 1]} : vector<4x8x128xbf16> to vector<4x8x32xbf16>
    %27 = vector.extract_strided_slice %16 {offsets = [0, 0, 0], sizes = [4, 8, 32], strides = [1, 1, 1]} : vector<4x8x128xbf16> to vector<4x8x32xbf16>
    "tpu.trace_start"() <{level = 10 : i32, message = "bqd,bkd->bqk"}> : () -> ()
    %cst_7 = arith.constant dense<0.000000e+00> : vector<4x8x8xf32>
    %28 = tpu.matmul %25, %26, %cst_7 {dimension_numbers = #tpu.dot_dimension_numbers<[2], [2], [1], [1], [0, 0, 0, 1, 1, 1], [0], [0]>} : vector<4x8x32xbf16>, vector<4x8x32xbf16>, vector<4x8x8xf32> -> vector<4x8x8xf32>
    %cst_8 = arith.constant -1.000000e+06 : f32
    "tpu.trace_stop"() : () -> ()
    %29 = vector.shape_cast %24 : vector<4x1x8xi1> to vector<4x1x8xi1>
    %30 = vector.broadcast %29 : vector<4x1x8xi1> to vector<4x8x8xi1>
    %31 = vector.broadcast %cst_8 : f32 to vector<4x8x8xf32>
    %32 = arith.select %30, %28, %31 : vector<4x8x8xi1>, vector<4x8x8xf32>
    %cst_9 = arith.constant dense<0xFF800000> : vector<4x8xf32>
    %33 = vector.multi_reduction <maximumf>, %32, %cst_9 [2] : vector<4x8x8xf32> to vector<4x8xf32>
    %34 = vector.shape_cast %33 : vector<4x8xf32> to vector<4x8x1xf32>
    %35 = vector.broadcast %34 : vector<4x8x1xf32> to vector<4x8x8xf32>
    %36 = arith.subf %32, %35 : vector<4x8x8xf32>
    %37 = arith.truncf %36 : vector<4x8x8xf32> to vector<4x8x8xbf16>
    %38 = math.exp %37 : vector<4x8x8xbf16>
    %39 = arith.extf %38 : vector<4x8x8xbf16> to vector<4x8x8xf32>
    %cst_10 = arith.constant dense<0.000000e+00> : vector<4x8xf32>
    %40 = vector.multi_reduction <add>, %39, %cst_10 [2] : vector<4x8x8xf32> to vector<4x8xf32>
    %41 = vector.shape_cast %40 : vector<4x8xf32> to vector<4x8x1xf32>
    %42 = tpu.reciprocal %41 {approx = true} : vector<4x8x1xf32> -> vector<4x8x1xf32>
    "tpu.trace_start"() <{level = 10 : i32, message = "bqk,bkd->bqd"}> : () -> ()
    %cst_11 = arith.constant dense<0.000000e+00> : vector<4x8x32xf32>
    %43 = tpu.matmul %38, %27, %cst_11 {dimension_numbers = #tpu.dot_dimension_numbers<[2], [1], [1], [2], [0, 0, 0, 1, 1, 2], [0], [0]>} : vector<4x8x8xbf16>, vector<4x8x32xbf16>, vector<4x8x32xf32> -> vector<4x8x32xf32>
    "tpu.trace_stop"() : () -> ()
    %44 = vector.broadcast %42 : vector<4x8x1xf32> to vector<4x8x32xf32>
    %45 = arith.mulf %43, %44 : vector<4x8x32xf32>
    %46 = arith.truncf %45 : vector<4x8x32xf32> to vector<4x8x32xbf16>
    %c0_12 = arith.constant 0 : index
    %c0_13 = arith.constant 0 : index
    %c0_14 = arith.constant 0 : index
    %47 = vector.load %arg16[%c0_12, %c0_13, %c0_14] : memref<4x8x128xbf16, #tpu.memory_space<vmem>>, vector<4x8x32xbf16>
    tpu.vector_store %arg16[%c0_12, %c0_13, %c0_14], %46 {strides = array<i32>} : memref<4x8x128xbf16, #tpu.memory_space<vmem>>, vector<4x8x32xbf16>,
    %48 = vector.extract_strided_slice %10 {offsets = [0, 0, 32], sizes = [4, 8, 32], strides = [1, 1, 1]} : vector<4x8x128xbf16> to vector<4x8x32xbf16>
    %49 = vector.extract_strided_slice %13 {offsets = [0, 0, 32], sizes = [4, 8, 32], strides = [1, 1, 1]} : vector<4x8x128xbf16> to vector<4x8x32xbf16>
    %50 = vector.extract_strided_slice %16 {offsets = [0, 0, 32], sizes = [4, 8, 32], strides = [1, 1, 1]} : vector<4x8x128xbf16> to vector<4x8x32xbf16>
    "tpu.trace_start"() <{level = 10 : i32, message = "bqd,bkd->bqk"}> : () -> ()
    %cst_15 = arith.constant dense<0.000000e+00> : vector<4x8x8xf32>
    %51 = tpu.matmul %48, %49, %cst_15 {dimension_numbers = #tpu.dot_dimension_numbers<[2], [2], [1], [1], [0, 0, 0, 1, 1, 1], [0], [0]>} : vector<4x8x32xbf16>, vector<4x8x32xbf16>, vector<4x8x8xf32> -> vector<4x8x8xf32>
    %cst_16 = arith.constant -1.000000e+06 : f32
    "tpu.trace_stop"() : () -> ()
    %52 = vector.shape_cast %24 : vector<4x1x8xi1> to vector<4x1x8xi1>
    %53 = vector.broadcast %52 : vector<4x1x8xi1> to vector<4x8x8xi1>
    %54 = vector.broadcast %cst_16 : f32 to vector<4x8x8xf32>
    %55 = arith.select %53, %51, %54 : vector<4x8x8xi1>, vector<4x8x8xf32>
    %cst_17 = arith.constant dense<0xFF800000> : vector<4x8xf32>
    %56 = vector.multi_reduction <maximumf>, %55, %cst_17 [2] : vector<4x8x8xf32> to vector<4x8xf32>
    %57 = vector.shape_cast %56 : vector<4x8xf32> to vector<4x8x1xf32>
    %58 = vector.broadcast %57 : vector<4x8x1xf32> to vector<4x8x8xf32>
    %59 = arith.subf %55, %58 : vector<4x8x8xf32>
    %60 = arith.truncf %59 : vector<4x8x8xf32> to vector<4x8x8xbf16>
    %61 = math.exp %60 : vector<4x8x8xbf16>
    %62 = arith.extf %61 : vector<4x8x8xbf16> to vector<4x8x8xf32>
    %cst_18 = arith.constant dense<0.000000e+00> : vector<4x8xf32>
    %63 = vector.multi_reduction <add>, %62, %cst_18 [2] : vector<4x8x8xf32> to vector<4x8xf32>
    %64 = vector.shape_cast %63 : vector<4x8xf32> to vector<4x8x1xf32>
    %65 = tpu.reciprocal %64 {approx = true} : vector<4x8x1xf32> -> vector<4x8x1xf32>
    "tpu.trace_start"() <{level = 10 : i32, message = "bqk,bkd->bqd"}> : () -> ()
    %cst_19 = arith.constant dense<0.000000e+00> : vector<4x8x32xf32>
    %66 = tpu.matmul %61, %50, %cst_19 {dimension_numbers = #tpu.dot_dimension_numbers<[2], [1], [1], [2], [0, 0, 0, 1, 1, 2], [0], [0]>} : vector<4x8x8xbf16>, vector<4x8x32xbf16>, vector<4x8x32xf32> -> vector<4x8x32xf32>
    "tpu.trace_stop"() : () -> ()
    %67 = vector.broadcast %65 : vector<4x8x1xf32> to vector<4x8x32xf32>
    %68 = arith.mulf %66, %67 : vector<4x8x32xf32>
    %69 = arith.truncf %68 : vector<4x8x32xf32> to vector<4x8x32xbf16>
    %c0_20 = arith.constant 0 : index
    %c0_21 = arith.constant 0 : index
    %c32 = arith.constant 32 : index
    %70 = vector.load %arg16[%c0_20, %c0_21, %c32] : memref<4x8x128xbf16, #tpu.memory_space<vmem>>, vector<4x8x32xbf16>
    tpu.vector_store %arg16[%c0_20, %c0_21, %c32], %69 {strides = array<i32>} : memref<4x8x128xbf16, #tpu.memory_space<vmem>>, vector<4x8x32xbf16>,
    %71 = vector.extract_strided_slice %10 {offsets = [0, 0, 64], sizes = [4, 8, 32], strides = [1, 1, 1]} : vector<4x8x128xbf16> to vector<4x8x32xbf16>
    %72 = vector.extract_strided_slice %13 {offsets = [0, 0, 64], sizes = [4, 8, 32], strides = [1, 1, 1]} : vector<4x8x128xbf16> to vector<4x8x32xbf16>
    %73 = vector.extract_strided_slice %16 {offsets = [0, 0, 64], sizes = [4, 8, 32], strides = [1, 1, 1]} : vector<4x8x128xbf16> to vector<4x8x32xbf16>
    "tpu.trace_start"() <{level = 10 : i32, message = "bqd,bkd->bqk"}> : () -> ()
    %cst_22 = arith.constant dense<0.000000e+00> : vector<4x8x8xf32>
    %74 = tpu.matmul %71, %72, %cst_22 {dimension_numbers = #tpu.dot_dimension_numbers<[2], [2], [1], [1], [0, 0, 0, 1, 1, 1], [0], [0]>} : vector<4x8x32xbf16>, vector<4x8x32xbf16>, vector<4x8x8xf32> -> vector<4x8x8xf32>
    %cst_23 = arith.constant -1.000000e+06 : f32
    "tpu.trace_stop"() : () -> ()
    %75 = vector.shape_cast %24 : vector<4x1x8xi1> to vector<4x1x8xi1>
    %76 = vector.broadcast %75 : vector<4x1x8xi1> to vector<4x8x8xi1>
    %77 = vector.broadcast %cst_23 : f32 to vector<4x8x8xf32>
    %78 = arith.select %76, %74, %77 : vector<4x8x8xi1>, vector<4x8x8xf32>
    %cst_24 = arith.constant dense<0xFF800000> : vector<4x8xf32>
    %79 = vector.multi_reduction <maximumf>, %78, %cst_24 [2] : vector<4x8x8xf32> to vector<4x8xf32>
    %80 = vector.shape_cast %79 : vector<4x8xf32> to vector<4x8x1xf32>
    %81 = vector.broadcast %80 : vector<4x8x1xf32> to vector<4x8x8xf32>
    %82 = arith.subf %78, %81 : vector<4x8x8xf32>
    %83 = arith.truncf %82 : vector<4x8x8xf32> to vector<4x8x8xbf16>
    %84 = math.exp %83 : vector<4x8x8xbf16>
    %85 = arith.extf %84 : vector<4x8x8xbf16> to vector<4x8x8xf32>
    %cst_25 = arith.constant dense<0.000000e+00> : vector<4x8xf32>
    %86 = vector.multi_reduction <add>, %85, %cst_25 [2] : vector<4x8x8xf32> to vector<4x8xf32>
    %87 = vector.shape_cast %86 : vector<4x8xf32> to vector<4x8x1xf32>
    %88 = tpu.reciprocal %87 {approx = true} : vector<4x8x1xf32> -> vector<4x8x1xf32>
    "tpu.trace_start"() <{level = 10 : i32, message = "bqk,bkd->bqd"}> : () -> ()
    %cst_26 = arith.constant dense<0.000000e+00> : vector<4x8x32xf32>
    %89 = tpu.matmul %84, %73, %cst_26 {dimension_numbers = #tpu.dot_dimension_numbers<[2], [1], [1], [2], [0, 0, 0, 1, 1, 2], [0], [0]>} : vector<4x8x8xbf16>, vector<4x8x32xbf16>, vector<4x8x32xf32> -> vector<4x8x32xf32>
    "tpu.trace_stop"() : () -> ()
    %90 = vector.broadcast %88 : vector<4x8x1xf32> to vector<4x8x32xf32>
    %91 = arith.mulf %89, %90 : vector<4x8x32xf32>
    %92 = arith.truncf %91 : vector<4x8x32xf32> to vector<4x8x32xbf16>
    %c0_27 = arith.constant 0 : index
    %c0_28 = arith.constant 0 : index
    %c64 = arith.constant 64 : index
    %93 = vector.load %arg16[%c0_27, %c0_28, %c64] : memref<4x8x128xbf16, #tpu.memory_space<vmem>>, vector<4x8x32xbf16>
    tpu.vector_store %arg16[%c0_27, %c0_28, %c64], %92 {strides = array<i32>} : memref<4x8x128xbf16, #tpu.memory_space<vmem>>, vector<4x8x32xbf16>,
    %94 = vector.extract_strided_slice %10 {offsets = [0, 0, 96], sizes = [4, 8, 32], strides = [1, 1, 1]} : vector<4x8x128xbf16> to vector<4x8x32xbf16>
    %95 = vector.extract_strided_slice %13 {offsets = [0, 0, 96], sizes = [4, 8, 32], strides = [1, 1, 1]} : vector<4x8x128xbf16> to vector<4x8x32xbf16>
    %96 = vector.extract_strided_slice %16 {offsets = [0, 0, 96], sizes = [4, 8, 32], strides = [1, 1, 1]} : vector<4x8x128xbf16> to vector<4x8x32xbf16>
    "tpu.trace_start"() <{level = 10 : i32, message = "bqd,bkd->bqk"}> : () -> ()
    %cst_29 = arith.constant dense<0.000000e+00> : vector<4x8x8xf32>
    %97 = tpu.matmul %94, %95, %cst_29 {dimension_numbers = #tpu.dot_dimension_numbers<[2], [2], [1], [1], [0, 0, 0, 1, 1, 1], [0], [0]>} : vector<4x8x32xbf16>, vector<4x8x32xbf16>, vector<4x8x8xf32> -> vector<4x8x8xf32>
    %cst_30 = arith.constant -1.000000e+06 : f32
    "tpu.trace_stop"() : () -> ()
    %98 = vector.shape_cast %24 : vector<4x1x8xi1> to vector<4x1x8xi1>
    %99 = vector.broadcast %98 : vector<4x1x8xi1> to vector<4x8x8xi1>
    %100 = vector.broadcast %cst_30 : f32 to vector<4x8x8xf32>
    %101 = arith.select %99, %97, %100 : vector<4x8x8xi1>, vector<4x8x8xf32>
    %cst_31 = arith.constant dense<0xFF800000> : vector<4x8xf32>
    %102 = vector.multi_reduction <maximumf>, %101, %cst_31 [2] : vector<4x8x8xf32> to vector<4x8xf32>
    %103 = vector.shape_cast %102 : vector<4x8xf32> to vector<4x8x1xf32>
    %104 = vector.broadcast %103 : vector<4x8x1xf32> to vector<4x8x8xf32>
    %105 = arith.subf %101, %104 : vector<4x8x8xf32>
    %106 = arith.truncf %105 : vector<4x8x8xf32> to vector<4x8x8xbf16>
    %107 = math.exp %106 : vector<4x8x8xbf16>
    %108 = arith.extf %107 : vector<4x8x8xbf16> to vector<4x8x8xf32>
    %cst_32 = arith.constant dense<0.000000e+00> : vector<4x8xf32>
    %109 = vector.multi_reduction <add>, %108, %cst_32 [2] : vector<4x8x8xf32> to vector<4x8xf32>
    %110 = vector.shape_cast %109 : vector<4x8xf32> to vector<4x8x1xf32>
    %111 = tpu.reciprocal %110 {approx = true} : vector<4x8x1xf32> -> vector<4x8x1xf32>
    "tpu.trace_start"() <{level = 10 : i32, message = "bqk,bkd->bqd"}> : () -> ()
    %cst_33 = arith.constant dense<0.000000e+00> : vector<4x8x32xf32>
    %112 = tpu.matmul %107, %96, %cst_33 {dimension_numbers = #tpu.dot_dimension_numbers<[2], [1], [1], [2], [0, 0, 0, 1, 1, 2], [0], [0]>} : vector<4x8x8xbf16>, vector<4x8x32xbf16>, vector<4x8x32xf32> -> vector<4x8x32xf32>
    "tpu.trace_stop"() : () -> ()
    %113 = vector.broadcast %111 : vector<4x8x1xf32> to vector<4x8x32xf32>
    %114 = arith.mulf %112, %113 : vector<4x8x32xf32>
    %115 = arith.truncf %114 : vector<4x8x32xf32> to vector<4x8x32xbf16>
    %c0_34 = arith.constant 0 : index
    %c0_35 = arith.constant 0 : index
    %c96 = arith.constant 96 : index
    %116 = vector.load %arg16[%c0_34, %c0_35, %c96] : memref<4x8x128xbf16, #tpu.memory_space<vmem>>, vector<4x8x32xbf16>
    tpu.vector_store %arg16[%c0_34, %c0_35, %c96], %115 {strides = array<i32>} : memref<4x8x128xbf16, #tpu.memory_space<vmem>>, vector<4x8x32xbf16>,
    %c0_36 = arith.constant 0 : index
    %c0_37 = arith.constant 0 : index
    %c0_38 = arith.constant 0 : index
    %117 = vector.load %arg16[%c0_36, %c0_37, %c0_38] : memref<4x8x128xbf16, #tpu.memory_space<vmem>>, vector<4x8x128xbf16>
    %118 = vector.shape_cast %117 : vector<4x8x128xbf16> to vector<32x128xbf16>
    %c0_39 = arith.constant 0 : index
    %c0_40 = arith.constant 0 : index
    %119 = vector.load %arg5[%c0_39, %c0_40] : memref<128x128xbf16, #tpu.memory_space<vmem>>, vector<128x128xbf16>
    %cst_41 = arith.constant dense<0.000000e+00> : vector<32x128xf32>
    %120 = tpu.matmul %118, %119, %cst_41 {dimension_numbers = #tpu.dot_dimension_numbers<[1], [0], [0], [1], [0, 0, 1, 1], [], []>} : vector<32x128xbf16>, vector<128x128xbf16>, vector<32x128xf32> -> vector<32x128xf32>
    %c0_42 = arith.constant 0 : index
    %c0_43 = arith.constant 0 : index
    %121 = vector.load %arg6[%c0_42, %c0_43] : memref<1x128xf32, #tpu.memory_space<vmem>>, vector<1x128xf32>
    %122 = vector.broadcast %121 : vector<1x128xf32> to vector<32x128xf32>
    %123 = arith.addf %120, %122 : vector<32x128xf32>
    %124 = arith.addf %2, %123 : vector<32x128xf32>
    %c0_44 = arith.constant 0 : index
    %c0_45 = arith.constant 0 : index
    %125 = vector.load %arg7[%c0_44, %c0_45] : memref<1x128xf32, #tpu.memory_space<vmem>>, vector<1x128xf32>
    %c0_46 = arith.constant 0 : index
    %c0_47 = arith.constant 0 : index
    %126 = vector.load %arg8[%c0_46, %c0_47] : memref<1x128xf32, #tpu.memory_space<vmem>>, vector<1x128xf32>
    %cst_48 = arith.constant dense<0.000000e+00> : vector<32xf32>
    %127 = vector.multi_reduction <add>, %124, %cst_48 [1] : vector<32x128xf32> to vector<32xf32>
    %128 = vector.shape_cast %127 : vector<32xf32> to vector<32x1xf32>
    %cst_49 = arith.constant 1.280000e+02 : f32
    %129 = vector.broadcast %cst_49 : f32 to vector<32x1xf32>
    %130 = arith.divf %128, %129 : vector<32x1xf32>
    %131 = vector.broadcast %130 : vector<32x1xf32> to vector<32x128xf32>
    %132 = arith.subf %124, %131 : vector<32x128xf32>
    %133 = arith.mulf %132, %132 : vector<32x128xf32>
    %cst_50 = arith.constant dense<0.000000e+00> : vector<32xf32>
    %134 = vector.multi_reduction <add>, %133, %cst_50 [1] : vector<32x128xf32> to vector<32xf32>
    %135 = vector.shape_cast %134 : vector<32xf32> to vector<32x1xf32>
    %cst_51 = arith.constant 1.280000e+02 : f32
    %136 = vector.broadcast %cst_51 : f32 to vector<32x1xf32>
    %137 = arith.divf %135, %136 : vector<32x1xf32>
    %138 = vector.broadcast %130 : vector<32x1xf32> to vector<32x128xf32>
    %139 = arith.subf %124, %138 : vector<32x128xf32>
    %cst_52 = arith.constant 9.99999974E-6 : f32
    %140 = vector.broadcast %cst_52 : f32 to vector<32x1xf32>
    %141 = arith.addf %137, %140 : vector<32x1xf32>
    %142 = math.rsqrt %141 : vector<32x1xf32>
    %143 = vector.broadcast %142 : vector<32x1xf32> to vector<32x128xf32>
    %144 = arith.mulf %139, %143 : vector<32x128xf32>
    %145 = vector.broadcast %125 : vector<1x128xf32> to vector<32x128xf32>
    %146 = arith.mulf %144, %145 : vector<32x128xf32>
    %147 = vector.broadcast %126 : vector<1x128xf32> to vector<32x128xf32>
    %148 = arith.addf %146, %147 : vector<32x128xf32>
    %149 = arith.truncf %148 : vector<32x128xf32> to vector<32x128xbf16>
    %c0_53 = arith.constant 0 : index
    %c0_54 = arith.constant 0 : index
    %150 = vector.load %arg9[%c0_53, %c0_54] : memref<128x256xbf16, #tpu.memory_space<vmem>>, vector<128x256xbf16>
    %cst_55 = arith.constant dense<0.000000e+00> : vector<32x256xf32>
    %151 = tpu.matmul %149, %150, %cst_55 {dimension_numbers = #tpu.dot_dimension_numbers<[1], [0], [0], [1], [0, 0, 1, 1], [], []>} : vector<32x128xbf16>, vector<128x256xbf16>, vector<32x256xf32> -> vector<32x256xf32>
    %c0_56 = arith.constant 0 : index
    %c0_57 = arith.constant 0 : index
    %152 = vector.load %arg10[%c0_56, %c0_57] : memref<1x256xf32, #tpu.memory_space<vmem>>, vector<1x256xf32>
    %153 = vector.broadcast %152 : vector<1x256xf32> to vector<32x256xf32>
    %154 = arith.addf %151, %153 : vector<32x256xf32>
    %cst_58 = arith.constant 0.000000e+00 : f32
    %155 = vector.broadcast %cst_58 : f32 to vector<32x256xf32>
    %156 = arith.maximumf %154, %155 : vector<32x256xf32>
    %157 = arith.truncf %156 : vector<32x256xf32> to vector<32x256xbf16>
    %c0_59 = arith.constant 0 : index
    %c0_60 = arith.constant 0 : index
    %158 = vector.load %arg11[%c0_59, %c0_60] : memref<256x128xbf16, #tpu.memory_space<vmem>>, vector<256x128xbf16>
    %cst_61 = arith.constant dense<0.000000e+00> : vector<32x128xf32>
    %159 = tpu.matmul %157, %158, %cst_61 {dimension_numbers = #tpu.dot_dimension_numbers<[1], [0], [0], [1], [0, 0, 1, 1], [], []>} : vector<32x256xbf16>, vector<256x128xbf16>, vector<32x128xf32> -> vector<32x128xf32>
    %c0_62 = arith.constant 0 : index
    %c0_63 = arith.constant 0 : index
    %160 = vector.load %arg12[%c0_62, %c0_63] : memref<1x128xf32, #tpu.memory_space<vmem>>, vector<1x128xf32>
    %161 = vector.broadcast %160 : vector<1x128xf32> to vector<32x128xf32>
    %162 = arith.addf %159, %161 : vector<32x128xf32>
    %163 = arith.addf %148, %162 : vector<32x128xf32>
    %c0_64 = arith.constant 0 : index
    %c0_65 = arith.constant 0 : index
    %164 = vector.load %arg13[%c0_64, %c0_65] : memref<1x128xf32, #tpu.memory_space<vmem>>, vector<1x128xf32>
    %c0_66 = arith.constant 0 : index
    %c0_67 = arith.constant 0 : index
    %165 = vector.load %arg14[%c0_66, %c0_67] : memref<1x128xf32, #tpu.memory_space<vmem>>, vector<1x128xf32>
    %cst_68 = arith.constant dense<0.000000e+00> : vector<32xf32>
    %166 = vector.multi_reduction <add>, %163, %cst_68 [1] : vector<32x128xf32> to vector<32xf32>
    %167 = vector.shape_cast %166 : vector<32xf32> to vector<32x1xf32>
    %cst_69 = arith.constant 1.280000e+02 : f32
    %168 = vector.broadcast %cst_69 : f32 to vector<32x1xf32>
    %169 = arith.divf %167, %168 : vector<32x1xf32>
    %170 = vector.broadcast %169 : vector<32x1xf32> to vector<32x128xf32>
    %171 = arith.subf %163, %170 : vector<32x128xf32>
    %172 = arith.mulf %171, %171 : vector<32x128xf32>
    %cst_70 = arith.constant dense<0.000000e+00> : vector<32xf32>
    %173 = vector.multi_reduction <add>, %172, %cst_70 [1] : vector<32x128xf32> to vector<32xf32>
    %174 = vector.shape_cast %173 : vector<32xf32> to vector<32x1xf32>
    %cst_71 = arith.constant 1.280000e+02 : f32
    %175 = vector.broadcast %cst_71 : f32 to vector<32x1xf32>
    %176 = arith.divf %174, %175 : vector<32x1xf32>
    %177 = vector.broadcast %169 : vector<32x1xf32> to vector<32x128xf32>
    %178 = arith.subf %163, %177 : vector<32x128xf32>
    %cst_72 = arith.constant 9.99999974E-6 : f32
    %179 = vector.broadcast %cst_72 : f32 to vector<32x1xf32>
    %180 = arith.addf %176, %179 : vector<32x1xf32>
    %181 = math.rsqrt %180 : vector<32x1xf32>
    %182 = vector.broadcast %181 : vector<32x1xf32> to vector<32x128xf32>
    %183 = arith.mulf %178, %182 : vector<32x128xf32>
    %184 = vector.broadcast %164 : vector<1x128xf32> to vector<32x128xf32>
    %185 = arith.mulf %183, %184 : vector<32x128xf32>
    %186 = vector.broadcast %165 : vector<1x128xf32> to vector<32x128xf32>
    %187 = arith.addf %185, %186 : vector<32x128xf32>
    %188 = vector.shape_cast %187 : vector<32x128xf32> to vector<4x8x128xf32>
    %c0_73 = arith.constant 0 : index
    %c0_74 = arith.constant 0 : index
    %c0_75 = arith.constant 0 : index
    %189 = vector.load %arg15[%c0_73, %c0_74, %c0_75] : memref<4x8x128xf32, #tpu.memory_space<vmem>>, vector<4x8x128xf32>
    tpu.vector_store %arg15[%c0_73, %c0_74, %c0_75], %188 {strides = array<i32>} : memref<4x8x128xf32, #tpu.memory_space<vmem>>, vector<4x8x128xf32>,
    return
  }
  func.func @transform_0(%arg0: i32) -> (i32, i32, i32) {
    %c0_i32 = arith.constant 0 : i32
    %c0_i32_0 = arith.constant 0 : i32
    %c0_i32_1 = arith.constant 0 : i32
    return %arg0, %c0_i32, %c0_i32_0 : i32, i32, i32
  }
  func.func @transform_1(%arg0: i32) -> (i32, i32) {
    %c0_i32 = arith.constant 0 : i32
    %c0_i32_0 = arith.constant 0 : i32
    %c0_i32_1 = arith.constant 0 : i32
    return %c0_i32, %c0_i32_0 : i32, i32
  }
  func.func @transform_2(%arg0: i32) -> (i32, i32) {
    %c0_i32 = arith.constant 0 : i32
    %c0_i32_0 = arith.constant 0 : i32
    %c0_i32_1 = arith.constant 0 : i32
    return %c0_i32, %c0_i32_0 : i32, i32
  }
  func.func @transform_3(%arg0: i32) -> (i32, i32) {
    %c0_i32 = arith.constant 0 : i32
    %c0_i32_0 = arith.constant 0 : i32
    %c0_i32_1 = arith.constant 0 : i32
    return %c0_i32, %c0_i32_0 : i32, i32
  }
  func.func @transform_4(%arg0: i32) -> (i32, i32) {
    %c0_i32 = arith.constant 0 : i32
    %c0_i32_0 = arith.constant 0 : i32
    %c0_i32_1 = arith.constant 0 : i32
    return %c0_i32, %c0_i32_0 : i32, i32
  }
  func.func @transform_5(%arg0: i32) -> (i32, i32) {
    %c0_i32 = arith.constant 0 : i32
    %c0_i32_0 = arith.constant 0 : i32
    %c0_i32_1 = arith.constant 0 : i32
    return %c0_i32, %c0_i32_0 : i32, i32
  }
  func.func @transform_6(%arg0: i32) -> (i32, i32) {
    %c0_i32 = arith.constant 0 : i32
    %c0_i32_0 = arith.constant 0 : i32
    %c0_i32_1 = arith.constant 0 : i32
    return %c0_i32, %c0_i32_0 : i32, i32
  }
  func.func @transform_7(%arg0: i32) -> (i32, i32) {
    %c0_i32 = arith.constant 0 : i32
    %c0_i32_0 = arith.constant 0 : i32
    %c0_i32_1 = arith.constant 0 : i32
    return %c0_i32, %c0_i32_0 : i32, i32
  }
  func.func @transform_8(%arg0: i32) -> (i32, i32) {
    %c0_i32 = arith.constant 0 : i32
    %c0_i32_0 = arith.constant 0 : i32
    %c0_i32_1 = arith.constant 0 : i32
    return %c0_i32, %c0_i32_0 : i32, i32
  }
  func.func @transform_9(%arg0: i32) -> (i32, i32) {
    %c0_i32 = arith.constant 0 : i32
    %c0_i32_0 = arith.constant 0 : i32
    %c0_i32_1 = arith.constant 0 : i32
    return %c0_i32, %c0_i32_0 : i32, i32
  }
  func.func @transform_10(%arg0: i32) -> (i32, i32) {
    %c0_i32 = arith.constant 0 : i32
    %c0_i32_0 = arith.constant 0 : i32
    %c0_i32_1 = arith.constant 0 : i32
    return %c0_i32, %c0_i32_0 : i32, i32
  }
  func.func @transform_11(%arg0: i32) -> (i32, i32) {
    %c0_i32 = arith.constant 0 : i32
    %c0_i32_0 = arith.constant 0 : i32
    %c0_i32_1 = arith.constant 0 : i32
    return %c0_i32, %c0_i32_0 : i32, i32
  }
  func.func @transform_12(%arg0: i32) -> (i32, i32) {
    %c0_i32 = arith.constant 0 : i32
    %c0_i32_0 = arith.constant 0 : i32
    %c0_i32_1 = arith.constant 0 : i32
    return %c0_i32, %c0_i32_0 : i32, i32
  }
  func.func @transform_13(%arg0: i32) -> (i32, i32) {
    %c0_i32 = arith.constant 0 : i32
    %c0_i32_0 = arith.constant 0 : i32
    %c0_i32_1 = arith.constant 0 : i32
    return %c0_i32, %c0_i32_0 : i32, i32
  }
  func.func @transform_14(%arg0: i32) -> (i32, i32, i32) {
    %c0_i32 = arith.constant 0 : i32
    %c0_i32_0 = arith.constant 0 : i32
    %c0_i32_1 = arith.constant 0 : i32
    return %arg0, %c0_i32, %c0_i32_0 : i32, i32, i32
  }
}

</mosaic_0001>

<bundles_post_ra>
// kernel: tpu_custom_call.1
= control target key start
LH: loop header
LB: loop body
LE: loop exit
PB: predicated region body
PF: predicated region fallthrough
CT: control target
= control target key end

     0   :  { %19 = vsyncpa [#allocation4], 0  ;;  %s4635_s0 = inlined_call_operand.hbm [shape: bf16[4,8,128], index: 0, kind: input, shape index: {}]   ;;  %s4636_s1 = inlined_call_operand.vmem [shape: s32[4,1], index: 1, kind: input, shape index: {}]   ;;  %s4637_s2 = inlined_call_operand.hbm [shape: bf16[128,384], index: 2, kind: input, shape index: {}]   ;;  %s4638_s3 = inlined_call_operand.vmem [shape: f32[1,384], index: 3, kind: input, shape index: {}]   ;;  %s4639_s4 = inlined_call_operand.hbm [shape: bf16[128,128], index: 4, kind: input, shape index: {}]   ;;  %s4640_s5 = inlined_call_operand.vmem [shape: f32[1,128], index: 5, kind: input, shape index: {}]   ;;  %s4641_s6 = inlined_call_operand.vmem [shape: f32[1,128], index: 6, kind: input, shape index: {}]   ;;  %s4642_s7 = inlined_call_operand.vmem [shape: f32[1,128], index: 7, kind: input, shape index: {}]   ;;  %s4643_s8 = inlined_call_operand.hbm [shape: bf16[128,256], index: 8, kind: input, shape index: {}]   ;;  %s4644_s9 = inlined_call_operand.vmem [shape: f32[1,256], index: 9, kind: input, shape index: {}]   ;;  %s4645_s10 = inlined_call_operand.hbm [shape: bf16[256,128], index: 10, kind: input, shape index: {}]   ;;  %s4646_s11 = inlined_call_operand.vmem [shape: f32[1,128], index: 11, kind: input, shape index: {}]   ;;  %s4647_s12 = inlined_call_operand.vmem [shape: f32[1,128], index: 12, kind: input, shape index: {}]   ;;  %s4648_s13 = inlined_call_operand.vmem [shape: f32[1,128], index: 13, kind: input, shape index: {}]   ;;  %s4649_s14 = inlined_call_operand.hbm [shape: f32[4,8,128], index: 14, kind: output, shape index: {}]  }
   0x1   :  { %20 = vsyncpa [#allocation7], 0 }
   0x2   :  { %21 = vsyncpa [#allocation10], 0 }
   0x3   :  { %22 = vsyncpa [#allocation5], 0  ;;  %s3902_s29 = smov [#allocation6]   ;;  %s3762_s17 = scalar_lea.hbm %s4637_s2, 3072 }
   0x4   :  { %s42_s30 = sshll.u32 %s3902_s29, 4  ;;  %p3763_p0 = scmp.ne.s32.totalorder %s4637_s2, %s3762_s17  ;;  %s43_s30 = int_to_ptr.vmem [resolvable:$true] %s42_s30 }
   0x5   :  { %p3766_p1 = scmp.lt.u32.totalorder %s3762_s17, %s4637_s2 }
   0x7   :  { %p3768_p2 = pnand %p3766_p1, %p3763_p0 }
   0x9   :  { %3771 = shalt.err (!%p3768_p2)
}
   0xa   :  { %s3772_s22 = scalar_lea.vmem %s43_s30, 3072  ;;  %p3777_p4 = scmp.lt.s32.totalorder %s43_s30, %s43_s30 }
   0xb   :  { %p3773_p3 = scmp.ne.s32.totalorder %s43_s30, %s3772_s22  ;;  %p3778_p5 = scmp.lt.s32.totalorder %s3772_s22, %s3772_s22 }
   0xd   :  { %p3779_p6 = por %p3778_p5, %p3777_p4 }
   0xf   :  { %p3780_p7 = pnand %p3779_p6, %p3773_p3 }
  0x11   :  { %3783 = shalt.err (!%p3780_p7)
}
  0x12   :  { %s3903_s23 = smov 192   ;;  %s3904_s24 = smov 12  }
  0x13   :  { %48 = dma.hbm_to_vmem [thread:$0]  %s4637_s2, 3072, %s43_s30, [#allocation7], %s3903_s23, %s3903_s23, %s3904_s24  }
  0x14   :  { %s3905_s27 = smov [#allocation9]   ;;  %s3784_s16 = scalar_lea.hbm %s4643_s8, 2048 }
  0x15   :  { %s74_s28 = sshll.u32 %s3905_s27, 4  ;;  %p3785_p8 = scmp.ne.s32.totalorder %s4643_s8, %s3784_s16  ;;  %s75_s28 = int_to_ptr.vmem [resolvable:$true] %s74_s28 }
  0x16   :  { %p3788_p9 = scmp.lt.u32.totalorder %s3784_s16, %s4643_s8 }
  0x18   :  { %p3790_p10 = pnand %p3788_p9, %p3785_p8 }
  0x1a   :  { %3793 = shalt.err (!%p3790_p10)
}
  0x1b   :  { %s3794_s21 = scalar_lea.vmem %s75_s28, 2048  ;;  %p3799_p12 = scmp.lt.s32.totalorder %s75_s28, %s75_s28 }
  0x1c   :  { %p3795_p11 = scmp.ne.s32.totalorder %s75_s28, %s3794_s21  ;;  %p3800_p13 = scmp.lt.s32.totalorder %s3794_s21, %s3794_s21 }
  0x1e   :  { %p3801_p0 = por %p3800_p13, %p3799_p12 }
  0x20   :  { %p3802_p1 = pnand %p3801_p0, %p3795_p11 }
  0x22   :  { %3805 = shalt.err (!%p3802_p1)
}
  0x23   :  { %s3906_s2 = smov 128   ;;  %s3907_s30 = smov 8  }
  0x24   :  { %80 = dma.hbm_to_vmem [thread:$0]  %s4643_s8, 2048, %s75_s28, [#allocation10], %s3906_s2, %s3906_s2, %s3907_s30  }
  0x25   :  { %s3908_s24 = smov [#allocation3]   ;;  %s3806_s29 = scalar_lea.hbm %s4635_s0, 256 }
  0x26   :  { %s28_s25 = sshll.u32 %s3908_s24, 4  ;;  %p3807_p2 = scmp.ne.s32.totalorder %s4635_s0, %s3806_s29  ;;  %s29_s25 = int_to_ptr.vmem [resolvable:$true] %s28_s25 }
  0x27   :  { %p3810_p3 = scmp.lt.u32.totalorder %s3806_s29, %s4635_s0 }
  0x29   :  { %p3812_p4 = pnand %p3810_p3, %p3807_p2 }
  0x2b   :  { %3815 = shalt.err (!%p3812_p4)
}
  0x2c   :  { %s3816_s19 = scalar_lea.vmem %s29_s25, 256  ;;  %p3821_p6 = scmp.lt.s32.totalorder %s29_s25, %s29_s25 }
  0x2d   :  { %p3817_p5 = scmp.ne.s32.totalorder %s29_s25, %s3816_s19  ;;  %p3822_p7 = scmp.lt.s32.totalorder %s3816_s19, %s3816_s19 }
  0x2f   :  { %p3823_p8 = por %p3822_p7, %p3821_p6 }
  0x31   :  { %p3824_p9 = pnand %p3823_p8, %p3817_p5 }
  0x33   :  { %3827 = shalt.err (!%p3824_p9)
}
  0x34   :  { %s3909_s8 = smov 64   ;;  %s3910_s28 = smov 4  }
  0x35   :  { %34 = dma.hbm_to_vmem [thread:$0]  %s4635_s0, 256, %s29_s25, [#allocation4], %s3909_s8, %s3909_s8, %s3910_s28  }
  0x36   :  { %s3911_s22 = smov [#allocation8]   ;;  %s3912_s24 = smov [#allocation11]  }
  0x37   :  { %s56_s23 = sshll.u32 %s3911_s22, 4  ;;  %s88_s26 = sshll.u32 %s3912_s24, 4  ;;  %s57_s23 = int_to_ptr.vmem [resolvable:$true] %s56_s23  ;;  %s89_s26 = int_to_ptr.vmem [resolvable:$true] %s88_s26 }
  0x38   :  { %s3828_s15 = scalar_lea.hbm %s4639_s4, 1024 }
  0x39   :  { %p3829_p10 = scmp.ne.s32.totalorder %s4639_s4, %s3828_s15  ;;  %p3832_p11 = scmp.lt.u32.totalorder %s3828_s15, %s4639_s4 }
  0x3b   :  { %p3834_p12 = pnand %p3832_p11, %p3829_p10 }
  0x3d   :  { %3837 = shalt.err (!%p3834_p12)
}
  0x3e   :  { %s3838_s0 = scalar_lea.vmem %s57_s23, 1024  ;;  %p3843_p0 = scmp.lt.s32.totalorder %s57_s23, %s57_s23 }
  0x3f   :  { %p3839_p13 = scmp.ne.s32.totalorder %s57_s23, %s3838_s0  ;;  %p3844_p1 = scmp.lt.s32.totalorder %s3838_s0, %s3838_s0 }
  0x41   :  { %p3845_p2 = por %p3844_p1, %p3843_p0 }
  0x43   :  { %p3846_p3 = pnand %p3845_p2, %p3839_p13 }
  0x45   :  { %3849 = shalt.err (!%p3846_p3)
}
  0x46   :  { %62 = dma.hbm_to_vmem [thread:$0]  %s4639_s4, 1024, %s57_s23, [#allocation7], %s3909_s8, %s3909_s8, %s3910_s28  }
  0x47   :  { %s3850_s24 = scalar_lea.hbm %s4645_s10, 2048 }
  0x48   :  { %p3851_p4 = scmp.ne.s32.totalorder %s4645_s10, %s3850_s24  ;;  %p3854_p5 = scmp.lt.u32.totalorder %s3850_s24, %s4645_s10 }
  0x4a   :  { %p3856_p6 = pnand %p3854_p5, %p3851_p4 }
  0x4c   :  { %3859 = shalt.err (!%p3856_p6)
}
  0x4d   :  { %s3860_s17 = scalar_lea.vmem %s89_s26, 2048  ;;  %p3865_p8 = scmp.lt.s32.totalorder %s89_s26, %s89_s26 }
  0x4e   :  { %p3861_p7 = scmp.ne.s32.totalorder %s89_s26, %s3860_s17  ;;  %p3866_p9 = scmp.lt.s32.totalorder %s3860_s17, %s3860_s17 }
  0x50   :  { %p3867_p10 = por %p3866_p9, %p3865_p8 }
  0x52   :  { %p3868_p11 = pnand %p3867_p10, %p3861_p7 }
  0x54   :  { %3871 = shalt.err (!%p3868_p11)
}
  0x55   :  { %94 = dma.hbm_to_vmem [thread:$0]  %s4645_s10, 2048, %s89_s26, [#allocation10], %s3909_s8, %s3909_s8, %s3910_s28  }
  0x56   :  { %3894 = dma.done.wait [#allocation4], 256  }
  0x57   :  { %3895 = vsyncadd [#allocation4], 4294967040 }
  0x58   :  { %3896 = dma.done.wait [#allocation7], 4096  }
  0x59   :  { %3897 = vsyncadd [#allocation7], 4294963200 }
  0x5a   :  { %3898 = dma.done.wait [#allocation10], 4096  }
  0x5b   :  { %3899 = vsyncadd [#allocation10], 4294963200  ;;  %v3913_v0 = vmov 0   ;;  %v3594_v1 = vld [vmem:[#allocation6 + $0x4] ss:$12 sps:$4 sm:$0xff]   ;;  %v119_v24 = vld [vmem:[#allocation3 + $0x8] sm:$0xff]   ;;  %v159_v28 = vlaneseq }
  0x5c   :  { %346 = vmatprep.mubr.bf16.mxu0 %v3913_v0  ;;  %3592 = vset.pattern.permute.xlu0 %v3913_v0  ;;  %v3596_v2 = vld [vmem:[#allocation6] ss:$12 sps:$4 sm:$0xff]   ;;  %v3597_v3 = vld [vmem:[#allocation6 + $0x1c] ss:$12 sps:$4 sm:$0xff]   ;;  %v3599_v4 = vld [vmem:[#allocation6 + $0x18] ss:$12 sps:$4 sm:$0xff]  }
  0x5d   :  { %3593 = vset.pattern.permute.xlu1 %v3913_v0  ;;  %314 = vmatprep.subr.bf16.mxu0 %v3594_v1  ;;  %v3600_v5 = vld [vmem:[#allocation6 + $0x34] ss:$12 sps:$4 sm:$0xff]   ;;  %v3602_v6 = vld [vmem:[#allocation6 + $0x30] ss:$12 sps:$4 sm:$0xff]   ;;  %v3603_v7 = vld [vmem:[#allocation6 + $0x4c] ss:$12 sps:$4 sm:$0xff]  }
  0x5e   :  { %315 = vmatpush1.bf16.msra.mxu0 %v3596_v2  ;;  %v3605_v8 = vld [vmem:[#allocation6 + $0x48] ss:$12 sps:$4 sm:$0xff]   ;;  %v3606_v10 = vld [vmem:[#allocation6 + $0x64] ss:$12 sps:$4 sm:$0xff]   ;;  %v3621_v12 = vld [vmem:[#allocation6 + $0x20] ss:$12 sps:$4 sm:$0xff]  }
  0x5f   :  { %316 = vmatprep.subr.bf16.mxu0 %v3597_v3  ;;  %v117_v9 = vld [vmem:[#allocation3] sm:$0xff]   ;;  %v3608_v13 = vld [vmem:[#allocation6 + $0x60] ss:$12 sps:$4 sm:$0xff]   ;;  %v3609_v14 = vld [vmem:[#allocation6 + $0x7c] ss:$12 sps:$4 sm:$0xff]   ;;  %v3914_v27 = vmov 0.0  }
  0x60   :  { %v3620_v11 = vld [vmem:[#allocation6 + $0x8] ss:$12 sps:$4 sm:$0xff]   ;;  %3358 = vmatprep.mubr.bf16.mxu1 %v117_v9  ;;  %v3622_v15 = vld [vmem:[#allocation6 + $0x38] ss:$12 sps:$4 sm:$0xff]   ;;  %v3623_v18 = vld [vmem:[#allocation6 + $0x50] ss:$12 sps:$4 sm:$0xff]  }
  0x61   :  { %3342 = vmatprep.subr.bf16.mxu1 %v3620_v11  ;;  %v3611_v16 = vld [vmem:[#allocation6 + $0x78] ss:$12 sps:$4 sm:$0xff]   ;;  %v3612_v17 = vld [vmem:[#allocation6 + $0x94] ss:$12 sps:$4 sm:$0xff]   ;;  %v3614_v19 = vld [vmem:[#allocation6 + $0x90] ss:$12 sps:$4 sm:$0xff]  }
  0x62   :  { %317 = vmatpush1.bf16.msra.mxu0 %v3599_v4  ;;  %3343 = vmatpush3.bf16.msra.mxu1 %v3620_v11  ;;  %v3615_v20 = vld [vmem:[#allocation6 + $0xac] ss:$12 sps:$4 sm:$0xff]   ;;  %v3624_v21 = vld [vmem:[#allocation6 + $0x68] ss:$12 sps:$4 sm:$0xff]   ;;  %v3627_v26 = vld [vmem:[#allocation6 + $0xb0] ss:$12 sps:$4 sm:$0xff]  }
  0x63   :  { %318 = vmatprep.subr.bf16.mxu0 %v3600_v5  ;;  %3344 = vmatprep.subr.bf16.mxu1 %v3621_v12  ;;  %v3617_v22 = vld [vmem:[#allocation6 + $0xa8] ss:$12 sps:$4 sm:$0xff]   ;;  %v3625_v23 = vld [vmem:[#allocation6 + $0x80] ss:$12 sps:$4 sm:$0xff]   ;;  %v3626_v25 = vld [vmem:[#allocation6 + $0x98] ss:$12 sps:$4 sm:$0xff]  }
  0x64   :  { %vm3915_vm0 = vmmov 0   ;;  %v3916_v29 = vmov 1966171168   ;;  %v4078_v31 = vshrl.u32 %v159_v28, 7  ;;  %v157_v41 = vld [vmem:[%s4638_s3] sm:$0x7] }
  0x65   :  { %v464_v30 = vunpack.c.l.s4 %v3916_v29  ;;  %v3113_v33 = vld.sshfl [vmem:[%s4636_s1] sm:$0x33 pattern:$0x75316420]  ;;  %vm513_vm1 = vcmask 261120   ;;  %vm766_vm2 = vcmask 1043456  }
  0x66   :  { %319 = vmatpush1.bf16.msra.mxu0 %v3602_v6  ;;  %3345 = vmatpush3.bf16.msra.mxu1 %v3621_v12  ;;  %v462_v35 = vcombine.high %v3113_v33, %v3113_v33  ;;  %v165_v40 = vsub.s32 1, %v4078_v31  ;;  %v4091_v43 = vsub.s32 0, %v4078_v31  ;;  %vm710_vm4 = vcmask 64512   ;;  %s3917_s1 = smov 96   ;;  %s3918_s3 = smov 32  }
  0x67   :  { %320 = vmatprep.subr.bf16.mxu0 %v3603_v7  ;;  %3346 = vmatprep.subr.bf16.mxu1 %v3622_v15  ;;  %v465_v32 = vunpack.c.0.s8 %v464_v30  ;;  %vm956_vm8 = vcmask 257024   ;;  %vm1441_vm9 = vcmask 519424   ;;  %vm1926_vm10 = vcmask 781824   ;;  %s3919_s29 = smov [#allocation12]  }
  0x68   :  { %v166_v42 = vrot.slane %v157_v41, %v165_v40  ;;  %v162_v49 = vrot.slane %v157_v41, %v4091_v43  ;;  %vm2411_vm11 = vcmask 1044224  }
  0x69   :  { %v468_v34 = vsub.s32 %v465_v32, %v4078_v31 }
  0x6a   :  { %321 = vmatpush1.bf16.msra.mxu0 %v3605_v8  ;;  %3347 = vmatpush3.bf16.msra.mxu1 %v3622_v15 }
  0x6b   :  { %322 = vmatprep.subr.bf16.mxu0 %v3606_v10  ;;  %3348 = vmatprep.subr.bf16.mxu1 %v3623_v18  ;;  %v469_v36 = vrot.slane %v3113_v33, %v468_v34  ;;  %v476_v38 = vrot.slane %v462_v35, %v468_v34  ;;  %v169_v10 = vsub.s32 2, %v4078_v31 }
  0x6d   :  { %482 = vperm.xlu0 %3592, %v469_v36   ;;  %v477_v37 = vcombine.high %v469_v36, %v469_v36  ;;  %v478_v39 = vcombine.high %v476_v38, %v476_v38 }
  0x6e   :  { %323 = vmatpush1.bf16.msra.mxu0 %v3608_v13  ;;  %3349 = vmatpush3.bf16.msra.mxu1 %v3623_v18  ;;  %v170_v13 = vrot.slane %v157_v41, %v169_v10 }
  0x6f   :  { %324 = vmatprep.subr.bf16.mxu0 %v3609_v14  ;;  %3350 = vmatprep.subr.bf16.mxu1 %v3624_v21 }
  0x70   :  { %496 = vperm.xlu1 %3593, %v477_v37  }
  0x71   :  { %489 = vperm.xlu0 %3592, %v476_v38  }
  0x72   :  { %325 = vmatpush1.bf16.msra.mxu0 %v3611_v16  ;;  %3351 = vmatpush3.bf16.msra.mxu1 %v3624_v21 }
  0x73   :  { %326 = vmatprep.subr.bf16.mxu0 %v3612_v17  ;;  %3352 = vmatprep.subr.bf16.mxu1 %v3625_v23 }
  0x74   :  { %503 = vperm.xlu1 %3593, %v478_v39  }
  0x76   :  { %327 = vmatpush1.bf16.msra.mxu0 %v3614_v19  ;;  %3353 = vmatpush3.bf16.msra.mxu1 %v3625_v23 }
  0x77   :  { %328 = vmatprep.subr.bf16.mxu0 %v3615_v20  ;;  %3354 = vmatprep.subr.bf16.mxu1 %v3626_v25 }
  0x7a   :  { %329 = vmatpush1.bf16.msra.mxu0 %v3617_v22  ;;  %3355 = vmatpush3.bf16.msra.mxu1 %v3626_v25  ;;  %v480_v25 = vand.u32 127, %v159_v28 }
  0x7b   :  { %3356 = vmatprep.subr.bf16.mxu1 %v3627_v26  ;;  %3362 = vmatprep.subr.bf16.mxu0 %v3914_v27 }
  0x7d   :  { %347 = vmatmul.mubr.bf16.vlgmr.msra.gmra.mrb[0].mxu0 %v117_v9 }
  0x7e   :  { %356 = vmatprep.mubr.bf16.mxu0 %v3913_v0  ;;  %3357 = vmatpush3.bf16.msra.mxu1 %v3627_v26 }
  0x7f   :  { %3374 = vmatprep.subr.bf16.mxu1 %v3914_v27 }
  0x81   :  { %3359 = vmatmul.mubr.bf16.vlgmr.msra.gmra.mrb[0].mxu1 %v119_v24 }
  0x82   :  { %3376 = vmatprep.mubr.msk.bf16.mxu1 %vm3915_vm0, %v3914_v27 }
  0x85   :  { %357 = vmatmul.mubr.bf16.gmra.mrb[4].mxu0 %v119_v24 }
  0x86   :  { %3364 = vmatprep.mubr.msk.bf16.mxu0 %vm3915_vm0, %v3914_v27 }
  0xec   :  { %v483_v24 = vpop.permute.xlu0 %482 }
  0xed   :  { %v487_v26 = vrot.slane %v483_v24, %v4091_v43 }
  0xef   :  { %vm4155_vm3 = vcmp.lt.s32.totalorder %v480_v25, %v487_v26  ;;  %v497_v30 = vpop.permute.xlu1 %496 }
  0xf0   :  { %v490_v35 = vpop.permute.xlu0 %489  ;;  %v501_v38 = vrot.slane %v497_v30, %v4091_v43 }
  0xf1   :  { %v494_v39 = vrot.slane %v490_v35, %v4091_v43 }
  0xf2   :  { %vm4164_vm5 = vcmp.lt.s32.totalorder %v480_v25, %v501_v38 }
  0xf3   :  { %vm4168_vm6 = vcmp.lt.s32.totalorder %v480_v25, %v494_v39 }
 0x150   :  { %v348_v44 = vpop.f32.mrb[0].mxu0 }
 0x151   :  { %v350_v45 = vpop.f32.mrb[1].mxu0  ;;  %v349_v53 = vadd.f32 %v348_v44, %v162_v49 }
 0x152   :  { %v351_v46 = vadd.f32 %v350_v45, %v166_v42  ;;  %v352_v47 = vpop.f32.mrb[2].mxu0 }
 0x153   :  { %v354_v48 = vpop.f32.mrb[3].mxu0  ;;  %v4101_v60 = vpack.c.bf16 %v349_v53, %v349_v53  ;;  %v353_v2 = vadd.f32 %v352_v47, %v162_v49 }
 0x154   :  { %v4094_v50 = vpack.c.bf16 %v351_v46, %v351_v46  ;;  %v355_v51 = vadd.f32 %v354_v48, %v166_v42  ;;  %v3360_v11 = vpop.f32.mrb[0].mxu1 }
 0x155   :  { %v4117_v5 = vpack.c.bf16 %v353_v2, %v353_v2  ;;  %v401_v12 = vpop.f32.mrb[1].mxu1  ;;  %v4139_v16 = vadd.f32 %v3360_v11, %v170_v13 }
 0x156   :  { %v518_v52 = vsel %vm513_vm1, %v4094_v50, 0  ;;  %v4099_v56 = vpack.c.bf16 %v355_v51, %v355_v51  ;;  %v3361_v14 = vpop.f32.mrb[2].mxu1  ;;  %v402_v17 = vadd.f32 %v401_v12, %v170_v13 }
 0x157   :  { %3363 = vmatpush3.bf16.xpose.msra.mxu0 %v518_v52  ;;  %v404_v15 = vpop.f32.mrb[3].mxu1  ;;  %v4141_v18 = vadd.f32 %v3361_v14, %v170_v13  ;;  %v4206_v30 = vpack.c.bf16 %v4139_v16, %v4139_v16 }
 0x158   :  { %v358_v54 = vpop.f32.mrb[4].mxu0  ;;  %3368 = vmatprep.subr.bf16.mxu0 %v3914_v27  ;;  %v564_v62 = vsel %vm513_vm1, %v4099_v56, 0  ;;  %v405_v19 = vadd.f32 %v404_v15, %v170_v13  ;;  %v4143_v20 = vpack.c.bf16 %v402_v17, %v402_v17 }
 0x159   :  { %v360_v55 = vpop.f32.mrb[5].mxu0  ;;  %v359_v3 = vadd.f32 %v358_v54, %v162_v49 }
 0x15a   :  { %v361_v57 = vadd.f32 %v360_v55, %v166_v42  ;;  %v362_v58 = vpop.f32.mrb[6].mxu0  ;;  %v4145_v21 = vpack.c.bf16 %v405_v19, %v405_v19  ;;  %v768_v22 = vsel %vm766_vm2, %v4143_v20, 0 }
 0x15b   :  { %v364_v59 = vpop.f32.mrb[7].mxu0  ;;  %v4119_v6 = vpack.c.bf16 %v359_v3, %v359_v3  ;;  %v363_v8 = vadd.f32 %v362_v58, %v162_v49 }
 0x15c   :  { %v4103_v61 = vpack.c.bf16 %v361_v57, %v361_v57  ;;  %v365_v1 = vadd.f32 %v364_v59, %v166_v42  ;;  %v814_v23 = vsel %vm766_vm2, %v4145_v21, 0  ;;  %v504_v42 = vpop.permute.xlu1 %503 }
 0x15d   :  { %v4132_v9 = vpack.c.bf16 %v363_v8, %v363_v8  ;;  %v508_v59 = vrot.slane %v504_v42, %v4091_v43 }
 0x15e   :  { %3365 = vmatmul.mubr.msk.bf16.vlgmr.msra.gmra.mrb[8].mxu0 %vm513_vm1, %v4101_v60  ;;  %v610_v63 = vsel %vm513_vm1, %v4103_v61, 0  ;;  %v4115_v4 = vpack.c.bf16 %v365_v1, %v365_v1 }
 0x15f   :  { %3369 = vmatpush3.bf16.xpose.msra.mxu0 %v564_v62  ;;  %3375 = vmatpush3.bf16.xpose.msra.mxu1 %v610_v63  ;;  %vm4179_vm7 = vcmp.lt.s32.totalorder %v480_v25, %v508_v59 }
 0x160   :  { %3370 = vmatprep.mubr.msk.bf16.mxu0 %vm3915_vm0, %v3914_v27  ;;  %3380 = vmatprep.subr.bf16.mxu0 %v3914_v27  ;;  %v656_v7 = vsel %vm513_vm1, %v4115_v4, 0 }
 0x161   :  { %3386 = vmatprep.subr.bf16.mxu1 %v3914_v27 }
 0x166   :  { %3371 = vmatmul.mubr.msk.bf16.vlgmr.msra.gmra.mrb[12].mxu0 %vm513_vm1, %v4117_v5  ;;  %3377 = vmatmul.mubr.msk.bf16.vlgmr.msra.gmra.mrb[4].mxu1 %vm513_vm1, %v4119_v6 }
 0x167   :  { %3381 = vmatpush3.bf16.xpose.msra.mxu0 %v656_v7  ;;  %3382 = vmatprep.mubr.msk.bf16.mxu0 %vm3915_vm0, %v3914_v27 }
 0x168   :  { %3392 = vmatprep.subr.bf16.mxu0 %v3914_v27  ;;  %3388 = vmatprep.mubr.msk.bf16.mxu1 %vm3915_vm0, %v3914_v27 }
 0x169   :  { %3387 = vmatpush3.bf16.msra.mxu1 %v768_v22 }
 0x16a   :  { %3398 = vmatprep.subr.bf16.mxu1 %v3914_v27 }
 0x16e   :  { %3383 = vmatmul.mubr.msk.bf16.vlgmr.msra.gmra.mrb[16].mxu0 %vm513_vm1, %v4132_v9 }
 0x16f   :  { %3394 = vmatprep.mubr.msk.bf16.mxu0 %vm3915_vm0, %v3914_v27  ;;  %3393 = vmatpush3.bf16.msra.mxu0 %v814_v23 }
 0x170   :  { %3404 = vmatprep.subr.bf16.mxu0 %v3914_v27 }
 0x231   :  { %v554_v32 = vpop.f32.mrb[8].mxu0 }
 0x232   :  { %v706_v33 = vsel %vm4155_vm3, %v554_v32, -1000000.0  ;;  %v3366_v34 = vpop.f32.mrb[9].mxu0 }
 0x233   :  { %v557_v36 = vpop.f32.mrb[10].mxu0  ;;  %v711_v37 = vsel %vm710_vm4, %v706_v33, -inf }
 0x234   :  { %712 = vmax.xlane.f32.xlu0 %v711_v37  ;;  %v3367_v28 = vpop.f32.mrb[11].mxu0  ;;  %v860_v37 = vsel %vm766_vm2, %v4206_v30, 0 }
 0x235   :  { %v4219_v28 = vpack.c.bf16 %v4141_v18, %v4141_v18 }
 0x239   :  { %v600_v45 = vpop.f32.mrb[12].mxu0  ;;  %v646_v46 = vpop.f32.mrb[4].mxu1 }
 0x23a   :  { %v707_v47 = vsel %vm4168_vm6, %v600_v45, -1000000.0  ;;  %v708_v48 = vsel %vm4164_vm5, %v646_v46, -1000000.0  ;;  %v3372_v49 = vpop.f32.mrb[13].mxu0  ;;  %v3378_v51 = vpop.f32.mrb[5].mxu1 }
 0x23b   :  { %v603_v52 = vpop.f32.mrb[14].mxu0  ;;  %v649_v53 = vpop.f32.mrb[6].mxu1  ;;  %v717_v54 = vsel %vm710_vm4, %v708_v48, -inf  ;;  %v714_v55 = vsel %vm710_vm4, %v707_v47, -inf }
 0x23c   :  { %v3379_v57 = vpop.f32.mrb[7].mxu1  ;;  %718 = vmax.xlane.f32.xlu0 %v717_v54  ;;  %715 = vmax.xlane.f32.xlu1 %v714_v55  ;;  %v3373_v58 = vpop.f32.mrb[15].mxu0 }
 0x241   :  { %v692_v63 = vpop.f32.mrb[16].mxu0 }
 0x242   :  { %v709_v1 = vsel %vm4179_vm7, %v692_v63, -1000000.0  ;;  %v3384_v2 = vpop.f32.mrb[17].mxu0 }
 0x243   :  { %v695_v3 = vpop.f32.mrb[18].mxu0  ;;  %v720_v7 = vsel %vm710_vm4, %v709_v1, -inf }
 0x244   :  { %721 = vmax.xlane.f32.xlu0 %v720_v7  ;;  %v3385_v8 = vpop.f32.mrb[19].mxu0 }
 0x24d   :  { %963 = vrot.lane.b32.xlu1 %v4094_v50, %s3917_s1 }
 0x251   :  { %961 = vrot.lane.b32.xlu1 %v4101_v60, %s3917_s1 }
 0x255   :  { %1011 = vrot.lane.b32.xlu1 %v4117_v5, %s3917_s1 }
 0x259   :  { %1113 = vrot.lane.b32.xlu1 %v4115_v4, %s3917_s1 }
 0x25a   :  { %1013 = vrot.lane.b32.xlu0 %v4099_v56, %s3917_s1 }
 0x25d   :  { %1111 = vrot.lane.b32.xlu1 %v4132_v9, %s3917_s1 }
 0x25e   :  { %1063 = vrot.lane.b32.xlu0 %v4103_v61, %s3917_s1 }
 0x261   :  { %1217 = vrot.lane.b32.xlu1 %v4143_v20, %s3917_s1 }
 0x262   :  { %1061 = vrot.lane.b32.xlu0 %v4119_v6, %s3917_s1 }
 0x2c1   :  { %v713_v10 = vpop.xlane.xlu0 %712 }
 0x2c2   :  { %v723_v11 = vsub.f32 %v706_v33, %v713_v10 }
 0x2c4   :  { %v727_v12 = vpack.c.bf16 %v723_v11, %v723_v11 }
 0x2c6   :  { %v732_v13 = vmul.bf16 1069105081, %v727_v12 }
 0x2c8   :  { %3680 = vpow.bf16 %v732_v13 }
 0x2c9   :  { %v719_v14 = vpop.xlane.xlu0 %718  ;;  %v716_v15 = vpop.xlane.xlu1 %715 }
 0x2ca   :  { %v725_v17 = vsub.f32 %v708_v48, %v719_v14  ;;  %v724_v19 = vsub.f32 %v707_v47, %v716_v15  ;;  %v906_v47 = vsel %vm766_vm2, %v4219_v28, 0 }
 0x2cc   :  { %v729_v22 = vpack.c.bf16 %v725_v17, %v725_v17  ;;  %v728_v23 = vpack.c.bf16 %v724_v19, %v724_v19 }
 0x2cd   :  { %v964_v24 = vpop.permute.xlu1 %963 }
 0x2ce   :  { %v738_v25 = vmul.bf16 1069105081, %v729_v22  ;;  %v735_v26 = vmul.bf16 1069105081, %v728_v23  ;;  %v969_v46 = vsel %vm513_vm1, %v964_v24, 0 }
 0x2d0   :  { %3682 = vpow.bf16 %v738_v25 }
 0x2d1   :  { %3684 = vpow.bf16 %v735_v26  ;;  %v722_v32 = vpop.xlane.xlu0 %721  ;;  %v962_v33 = vpop.permute.xlu1 %961 }
 0x2d2   :  { %v726_v34 = vsub.f32 %v709_v1, %v722_v32 }
 0x2d3   :  { %v4208_v35 = vpop.eup %3680 }
 0x2d4   :  { %v730_v36 = vpack.c.bf16 %v726_v34, %v726_v34  ;;  %3389 = vmatmul.mubr.msk.bf16.vlgmr.msra.gmra.mrb[8].mxu1 %vm710_vm4, %v4208_v35 }
 0x2d5   :  { %3399 = vmatpush3.bf16.msra.mxu1 %v860_v37  ;;  %3400 = vmatprep.mubr.msk.bf16.mxu1 %vm3915_vm0, %v3914_v27  ;;  %v1012_v38 = vpop.permute.xlu1 %1011  ;;  %v1014_v45 = vpop.permute.xlu0 %1013 }
 0x2d6   :  { %v741_v16 = vmul.bf16 1069105081, %v730_v36  ;;  %3410 = vmatprep.subr.bf16.mxu1 %v3914_v27  ;;  %v1019_v53 = vsel %vm513_vm1, %v1014_v45, 0 }
 0x2d8   :  { %3686 = vpow.bf16 %v741_v16 }
 0x2d9   :  { %v1114_v18 = vpop.permute.xlu1 %1113  ;;  %v1064_v48 = vpop.permute.xlu0 %1063 }
 0x2da   :  { %v1069_v52 = vsel %vm513_vm1, %v1064_v48, 0  ;;  %v1119_v58 = vsel %vm513_vm1, %v1114_v18, 0 }
 0x2db   :  { %v4221_v39 = vpop.eup %3682 }
 0x2dc   :  { %v4223_v42 = vpop.eup %3684  ;;  %3401 = vmatmul.mubr.msk.bf16.vlgmr.msra.gmra.mrb[12].mxu1 %vm710_vm4, %v4221_v39 }
 0x2dd   :  { %3395 = vmatmul.mubr.msk.bf16.vlgmr.msra.gmra.mrb[20].mxu0 %vm710_vm4, %v4223_v42  ;;  %3412 = vmatprep.mubr.msk.bf16.mxu1 %vm3915_vm0, %v3914_v27  ;;  %v1112_v51 = vpop.permute.xlu1 %1111  ;;  %v1062_v55 = vpop.permute.xlu0 %1061 }
 0x2de   :  { %3405 = vmatpush3.bf16.msra.mxu0 %v906_v47  ;;  %3411 = vmatpush3.bf16.xpose.msra.mxu1 %v969_v46 }
 0x2df   :  { %3406 = vmatprep.mubr.msk.bf16.mxu0 %vm3915_vm0, %v3914_v27  ;;  %3416 = vmatprep.subr.bf16.mxu0 %v3914_v27 }
 0x2e0   :  { %3422 = vmatprep.subr.bf16.mxu1 %v3914_v27 }
 0x2e1   :  { %v1218_v54 = vpop.permute.xlu1 %1217 }
 0x2e2   :  { %v1223_v57 = vsel %vm766_vm2, %v1218_v54, 0 }
 0x2e3   :  { %v4238_v49 = vpop.eup %3686 }
 0x2e5   :  { %3407 = vmatmul.mubr.msk.bf16.vlgmr.msra.gmra.mrb[24].mxu0 %vm710_vm4, %v4238_v49  ;;  %3413 = vmatmul.mubr.msk.bf16.vlgmr.msra.gmra.mrb[16].mxu1 %vm513_vm1, %v962_v33 }
 0x2e6   :  { %3423 = vmatpush3.bf16.xpose.msra.mxu1 %v1069_v52  ;;  %3418 = vmatprep.mubr.msk.bf16.mxu0 %vm3915_vm0, %v3914_v27 }
 0x2e7   :  { %3417 = vmatpush3.bf16.xpose.msra.mxu0 %v1019_v53  ;;  %3424 = vmatprep.mubr.msk.bf16.mxu1 %vm3915_vm0, %v3914_v27 }
 0x2e8   :  { %3428 = vmatprep.subr.bf16.mxu0 %v3914_v27  ;;  %3434 = vmatprep.subr.bf16.mxu1 %v3914_v27 }
 0x2ed   :  { %3425 = vmatmul.mubr.msk.bf16.vlgmr.msra.gmra.mrb[20].mxu1 %vm513_vm1, %v1062_v55 }
 0x2ee   :  { %3419 = vmatmul.mubr.msk.bf16.vlgmr.msra.gmra.mrb[28].mxu0 %vm513_vm1, %v1012_v38  ;;  %3435 = vmatpush3.bf16.msra.mxu1 %v1223_v57 }
 0x2ef   :  { %3429 = vmatpush3.bf16.xpose.msra.mxu0 %v1119_v58  ;;  %3430 = vmatprep.mubr.msk.bf16.mxu0 %vm3915_vm0, %v3914_v27 }
 0x2f0   :  { %3436 = vmatprep.mubr.msk.bf16.mxu1 %vm3915_vm0, %v3914_v27  ;;  %3446 = vmatprep.subr.bf16.mxu1 %v3914_v27 }
 0x2f1   :  { %3440 = vmatprep.subr.bf16.mxu0 %v3914_v27 }
 0x2f6   :  { %3431 = vmatmul.mubr.msk.bf16.vlgmr.msra.gmra.mrb[32].mxu0 %vm513_vm1, %v1112_v51 }
 0x2f7   :  { %3442 = vmatprep.mubr.msk.bf16.mxu0 %vm3915_vm0, %v3914_v27 }
 0x3a7   :  { %v4264_v59 = vpop.f32.mrb[8].mxu1 }
 0x3a8   :  { %v3390_v63 = vpop.f32.mrb[9].mxu1 }
 0x3a9   :  { %v807_v1 = vpop.f32.mrb[10].mxu1 }
 0x3aa   :  { %v3391_v2 = vpop.f32.mrb[11].mxu1 }
 0x3af   :  { %v4266_v3 = vpop.f32.mrb[12].mxu1 }
 0x3b0   :  { %v4268_v7 = vpop.f32.mrb[20].mxu0  ;;  %v3402_v8 = vpop.f32.mrb[13].mxu1 }
 0x3b1   :  { %v3396_v10 = vpop.f32.mrb[21].mxu0  ;;  %v899_v11 = vpop.f32.mrb[14].mxu1 }
 0x3b2   :  { %v853_v12 = vpop.f32.mrb[22].mxu0  ;;  %v3403_v13 = vpop.f32.mrb[15].mxu1 }
 0x3b3   :  { %v3397_v14 = vpop.f32.mrb[23].mxu0 }
 0x3b8   :  { %v4270_v15 = vpop.f32.mrb[24].mxu0  ;;  %v1005_v17 = vpop.f32.mrb[16].mxu1 }
 0x3b9   :  { %v1161_v19 = vsel %vm4155_vm3, %v1005_v17, -1000000.0  ;;  %v3408_v22 = vpop.f32.mrb[25].mxu0  ;;  %v3414_v23 = vpop.f32.mrb[17].mxu1 }
 0x3ba   :  { %v945_v24 = vpop.f32.mrb[26].mxu0  ;;  %v1008_v25 = vpop.f32.mrb[18].mxu1  ;;  %v1165_v26 = vsel %vm710_vm4, %v1161_v19, -inf }
 0x3bb   :  { %v3415_v32 = vpop.f32.mrb[19].mxu1  ;;  %1166 = vmax.xlane.f32.xlu0 %v1165_v26  ;;  %v3409_v33 = vpop.f32.mrb[27].mxu0 }
 0x3c0   :  { %v1105_v34 = vpop.f32.mrb[20].mxu1 }
 0x3c1   :  { %v1055_v36 = vpop.f32.mrb[28].mxu0  ;;  %v1163_v37 = vsel %vm4164_vm5, %v1105_v34, -1000000.0  ;;  %v3426_v16 = vpop.f32.mrb[21].mxu1 }
 0x3c2   :  { %v1162_v38 = vsel %vm4168_vm6, %v1055_v36, -1000000.0  ;;  %v3420_v45 = vpop.f32.mrb[29].mxu0  ;;  %v1108_v46 = vpop.f32.mrb[22].mxu1  ;;  %v1171_v47 = vsel %vm710_vm4, %v1163_v37, -inf }
 0x3c3   :  { %v1058_v18 = vpop.f32.mrb[30].mxu0  ;;  %1172 = vmax.xlane.f32.xlu0 %v1171_v47  ;;  %v3427_v48 = vpop.f32.mrb[23].mxu1  ;;  %v1168_v51 = vsel %vm710_vm4, %v1162_v38, -inf }
 0x3c4   :  { %1169 = vmax.xlane.f32.xlu1 %v1168_v51  ;;  %v3421_v52 = vpop.f32.mrb[31].mxu0 }
 0x3c9   :  { %v1155_v53 = vpop.f32.mrb[32].mxu0 }
 0x3ca   :  { %v1164_v54 = vsel %vm4179_vm7, %v1155_v53, -1000000.0  ;;  %v3432_v55 = vpop.f32.mrb[33].mxu0 }
 0x3cb   :  { %v1158_v57 = vpop.f32.mrb[34].mxu0  ;;  %v1174_v58 = vsel %vm710_vm4, %v1164_v54, -inf }
 0x3cc   :  { %1175 = vmax.xlane.f32.xlu0 %v1174_v58  ;;  %v3433_v63 = vpop.f32.mrb[35].mxu0 }
 0x3d5   :  { %1313 = vrot.lane.b32.xlu1 %v4206_v30, %s3917_s1 }
 0x3d9   :  { %1361 = vrot.lane.b32.xlu1 %v4219_v28, %s3917_s1 }
 0x3dd   :  { %1498 = vrot.lane.b32.xlu1 %v4099_v56, %s3909_s8 }
 0x3e1   :  { %1496 = vrot.lane.b32.xlu1 %v4117_v5, %s3909_s8 }
 0x3e2   :  { %1265 = vrot.lane.b32.xlu0 %v4145_v21, %s3917_s1 }
 0x3e5   :  { %1598 = vrot.lane.b32.xlu1 %v4115_v4, %s3909_s8 }
 0x3e6   :  { %1448 = vrot.lane.b32.xlu0 %v4094_v50, %s3909_s8 }
 0x3e9   :  { %1596 = vrot.lane.b32.xlu1 %v4132_v9, %s3909_s8 }
 0x3ea   :  { %1446 = vrot.lane.b32.xlu0 %v4101_v60, %s3909_s8 }
 0x3ed   :  { %1702 = vrot.lane.b32.xlu1 %v4143_v20, %s3909_s8 }
 0x3ee   :  { %1548 = vrot.lane.b32.xlu0 %v4103_v61, %s3909_s8 }
 0x3f2   :  { %1546 = vrot.lane.b32.xlu0 %v4119_v6, %s3909_s8 }
 0x448   :  { %v1167_v1 = vpop.xlane.xlu0 %1166 }
 0x449   :  { %v1177_v2 = vsub.f32 %v1161_v19, %v1167_v1 }
 0x44b   :  { %v1181_v8 = vpack.c.bf16 %v1177_v2, %v1177_v2 }
 0x44d   :  { %v1186_v10 = vmul.bf16 1069105081, %v1181_v8 }
 0x44f   :  { %3688 = vpow.bf16 %v1186_v10 }
 0x450   :  { %v1173_v11 = vpop.xlane.xlu0 %1172 }
 0x451   :  { %v1179_v12 = vsub.f32 %v1163_v37, %v1173_v11  ;;  %v1170_v13 = vpop.xlane.xlu1 %1169 }
 0x452   :  { %v1178_v14 = vsub.f32 %v1162_v38, %v1170_v13 }
 0x453   :  { %v1183_v17 = vpack.c.bf16 %v1179_v12, %v1179_v12 }
 0x454   :  { %v1182_v22 = vpack.c.bf16 %v1178_v14, %v1178_v14 }
 0x455   :  { %v1192_v23 = vmul.bf16 1069105081, %v1183_v17  ;;  %v1314_v24 = vpop.permute.xlu1 %1313 }
 0x456   :  { %v1189_v25 = vmul.bf16 1069105081, %v1182_v22  ;;  %v1319_v19 = vsel %vm766_vm2, %v1314_v24, 0 }
 0x457   :  { %3690 = vpow.bf16 %v1192_v23 }
 0x458   :  { %3692 = vpow.bf16 %v1189_v25 }
 0x459   :  { %v1362_v26 = vpop.permute.xlu1 %1361  ;;  %v1176_v32 = vpop.xlane.xlu0 %1175 }
 0x45a   :  { %v4308_v33 = vpop.eup %3688  ;;  %v1180_v34 = vsub.f32 %v1164_v54, %v1176_v32  ;;  %v1367_v51 = vsel %vm766_vm2, %v1362_v26, 0 }
 0x45b   :  { %3437 = vmatmul.mubr.msk.bf16.vlgmr.msra.gmra.mrb[24].mxu1 %vm710_vm4, %v4308_v33 }
 0x45c   :  { %v1184_v36 = vpack.c.bf16 %v1180_v34, %v1180_v34  ;;  %3447 = vmatpush3.bf16.msra.mxu1 %v1319_v19  ;;  %3448 = vmatprep.mubr.msk.bf16.mxu1 %vm3915_vm0, %v3914_v27 }
 0x45d   :  { %v1499_v37 = vpop.permute.xlu1 %1498  ;;  %v1266_v16 = vpop.permute.xlu0 %1265  ;;  %3458 = vmatprep.subr.bf16.mxu1 %v3914_v27 }
 0x45e   :  { %v1195_v38 = vmul.bf16 1069105081, %v1184_v36  ;;  %v1271_v45 = vsel %vm766_vm2, %v1266_v16, 0  ;;  %v1504_v1 = vsel %vm513_vm1, %v1499_v37, 0 }
 0x45f   :  { %3441 = vmatpush3.bf16.msra.mxu0 %v1271_v45 }
 0x460   :  { %3694 = vpow.bf16 %v1195_v38  ;;  %3452 = vmatprep.subr.bf16.mxu0 %v3914_v27 }
 0x461   :  { %v1497_v46 = vpop.permute.xlu1 %1496  ;;  %v1449_v47 = vpop.permute.xlu0 %1448 }
 0x462   :  { %v4318_v18 = vpop.eup %3690  ;;  %v1454_v52 = vsel %vm513_vm1, %v1449_v47, 0 }
 0x463   :  { %v4320_v48 = vpop.eup %3692  ;;  %3449 = vmatmul.mubr.msk.bf16.vlgmr.msra.gmra.mrb[28].mxu1 %vm710_vm4, %v4318_v18 }
 0x464   :  { %3443 = vmatmul.mubr.msk.bf16.vlgmr.msra.gmra.mrb[36].mxu0 %vm710_vm4, %v4320_v48  ;;  %3460 = vmatprep.mubr.msk.bf16.mxu1 %vm3915_vm0, %v3914_v27 }
 0x465   :  { %3453 = vmatpush3.bf16.msra.mxu0 %v1367_v51  ;;  %v1599_v53 = vpop.permute.xlu1 %1598  ;;  %3459 = vmatpush3.bf16.xpose.msra.mxu1 %v1454_v52  ;;  %v1447_v54 = vpop.permute.xlu0 %1446 }
 0x466   :  { %3454 = vmatprep.mubr.msk.bf16.mxu0 %vm3915_vm0, %v3914_v27  ;;  %3464 = vmatprep.subr.bf16.mxu0 %v3914_v27  ;;  %v1604_v11 = vsel %vm513_vm1, %v1599_v53, 0 }
 0x467   :  { %3470 = vmatprep.subr.bf16.mxu1 %v3914_v27 }
 0x469   :  { %v1549_v55 = vpop.permute.xlu0 %1548  ;;  %v1597_v58 = vpop.permute.xlu1 %1596 }
 0x46a   :  { %v1554_v63 = vsel %vm513_vm1, %v1549_v55, 0 }
 0x46b   :  { %v4334_v57 = vpop.eup %3694 }
 0x46c   :  { %3455 = vmatmul.mubr.msk.bf16.vlgmr.msra.gmra.mrb[40].mxu0 %vm710_vm4, %v4334_v57  ;;  %3461 = vmatmul.mubr.msk.bf16.vlgmr.msra.gmra.mrb[32].mxu1 %vm513_vm1, %v1447_v54 }
 0x46d   :  { %3471 = vmatpush3.bf16.xpose.msra.mxu1 %v1554_v63  ;;  %3466 = vmatprep.mubr.msk.bf16.mxu0 %vm3915_vm0, %v3914_v27  ;;  %v1703_v2 = vpop.permute.xlu1 %1702  ;;  %v1547_v8 = vpop.permute.xlu0 %1546 }
 0x46e   :  { %3465 = vmatpush3.bf16.xpose.msra.mxu0 %v1504_v1  ;;  %3472 = vmatprep.mubr.msk.bf16.mxu1 %vm3915_vm0, %v3914_v27  ;;  %v1708_v10 = vsel %vm766_vm2, %v1703_v2, 0 }
 0x46f   :  { %3476 = vmatprep.subr.bf16.mxu0 %v3914_v27  ;;  %3482 = vmatprep.subr.bf16.mxu1 %v3914_v27 }
 0x474   :  { %3473 = vmatmul.mubr.msk.bf16.vlgmr.msra.gmra.mrb[36].mxu1 %vm513_vm1, %v1547_v8 }
 0x475   :  { %3467 = vmatmul.mubr.msk.bf16.vlgmr.msra.gmra.mrb[44].mxu0 %vm513_vm1, %v1497_v46  ;;  %3483 = vmatpush3.bf16.msra.mxu1 %v1708_v10 }
 0x476   :  { %3477 = vmatpush3.bf16.xpose.msra.mxu0 %v1604_v11  ;;  %3478 = vmatprep.mubr.msk.bf16.mxu0 %vm3915_vm0, %v3914_v27 }
 0x477   :  { %3484 = vmatprep.mubr.msk.bf16.mxu1 %vm3915_vm0, %v3914_v27  ;;  %3494 = vmatprep.subr.bf16.mxu1 %v3914_v27 }
 0x478   :  { %3488 = vmatprep.subr.bf16.mxu0 %v3914_v27 }
 0x47d   :  { %3479 = vmatmul.mubr.msk.bf16.vlgmr.msra.gmra.mrb[48].mxu0 %vm513_vm1, %v1597_v58 }
 0x47e   :  { %3490 = vmatprep.mubr.msk.bf16.mxu0 %vm3915_vm0, %v3914_v27 }
 0x52e   :  { %v4360_v12 = vpop.f32.mrb[24].mxu1 }
 0x52f   :  { %v3438_v13 = vpop.f32.mrb[25].mxu1 }
 0x530   :  { %v1262_v14 = vpop.f32.mrb[26].mxu1 }
 0x531   :  { %v3439_v17 = vpop.f32.mrb[27].mxu1 }
 0x536   :  { %v4362_v22 = vpop.f32.mrb[28].mxu1 }
 0x537   :  { %v4364_v23 = vpop.f32.mrb[36].mxu0  ;;  %v3450_v24 = vpop.f32.mrb[29].mxu1 }
 0x538   :  { %v3444_v25 = vpop.f32.mrb[37].mxu0  ;;  %v1358_v26 = vpop.f32.mrb[30].mxu1 }
 0x539   :  { %v1310_v32 = vpop.f32.mrb[38].mxu0  ;;  %v3451_v34 = vpop.f32.mrb[31].mxu1 }
 0x53a   :  { %v3445_v19 = vpop.f32.mrb[39].mxu0 }
 0x53f   :  { %v4366_v36 = vpop.f32.mrb[40].mxu0  ;;  %v1490_v37 = vpop.f32.mrb[32].mxu1 }
 0x540   :  { %v1646_v16 = vsel %vm4155_vm3, %v1490_v37, -1000000.0  ;;  %v3456_v38 = vpop.f32.mrb[41].mxu0  ;;  %v3462_v45 = vpop.f32.mrb[33].mxu1 }
 0x541   :  { %v1406_v46 = vpop.f32.mrb[42].mxu0  ;;  %v1493_v47 = vpop.f32.mrb[34].mxu1  ;;  %v1650_v51 = vsel %vm710_vm4, %v1646_v16, -inf }
 0x542   :  { %1651 = vmax.xlane.f32.xlu0 %v1650_v51  ;;  %v3457_v52 = vpop.f32.mrb[43].mxu0  ;;  %v3463_v53 = vpop.f32.mrb[35].mxu1 }
 0x547   :  { %v1590_v54 = vpop.f32.mrb[36].mxu1 }
 0x548   :  { %v1540_v55 = vpop.f32.mrb[44].mxu0  ;;  %v1648_v58 = vsel %vm4164_vm5, %v1590_v54, -1000000.0  ;;  %v3474_v63 = vpop.f32.mrb[37].mxu1 }
 0x549   :  { %v1647_v1 = vsel %vm4168_vm6, %v1540_v55, -1000000.0  ;;  %v3468_v2 = vpop.f32.mrb[45].mxu0  ;;  %v1593_v8 = vpop.f32.mrb[38].mxu1  ;;  %v1656_v10 = vsel %vm710_vm4, %v1648_v58, -inf }
 0x54a   :  { %v1543_v11 = vpop.f32.mrb[46].mxu0  ;;  %1657 = vmax.xlane.f32.xlu0 %v1656_v10  ;;  %v3475_v13 = vpop.f32.mrb[39].mxu1  ;;  %v1653_v14 = vsel %vm710_vm4, %v1647_v1, -inf }
 0x54b   :  { %1654 = vmax.xlane.f32.xlu1 %v1653_v14  ;;  %v3469_v17 = vpop.f32.mrb[47].mxu0 }
 0x550   :  { %v1640_v24 = vpop.f32.mrb[48].mxu0 }
 0x551   :  { %v1649_v25 = vsel %vm4179_vm7, %v1640_v24, -1000000.0  ;;  %v3480_v26 = vpop.f32.mrb[49].mxu0 }
 0x552   :  { %v1643_v32 = vpop.f32.mrb[50].mxu0  ;;  %v1659_v34 = vsel %vm710_vm4, %v1649_v25, -inf }
 0x553   :  { %1660 = vmax.xlane.f32.xlu0 %v1659_v34  ;;  %v3481_v19 = vpop.f32.mrb[51].mxu0 }
 0x55c   :  { %1798 = vrot.lane.b32.xlu1 %v4206_v30, %s3909_s8 }
 0x560   :  { %1846 = vrot.lane.b32.xlu1 %v4219_v28, %s3909_s8 }
 0x564   :  { %1983 = vrot.lane.b32.xlu1 %v4099_v56, %s3918_s3 }
 0x568   :  { %1981 = vrot.lane.b32.xlu1 %v4117_v5, %s3918_s3 }
 0x569   :  { %1750 = vrot.lane.b32.xlu0 %v4145_v21, %s3909_s8 }
 0x56c   :  { %2083 = vrot.lane.b32.xlu1 %v4115_v4, %s3918_s3 }
 0x56d   :  { %1933 = vrot.lane.b32.xlu0 %v4094_v50, %s3918_s3 }
 0x570   :  { %2081 = vrot.lane.b32.xlu1 %v4132_v9, %s3918_s3 }
 0x571   :  { %1931 = vrot.lane.b32.xlu0 %v4101_v60, %s3918_s3 }
 0x574   :  { %2187 = vrot.lane.b32.xlu1 %v4143_v20, %s3918_s3 }
 0x575   :  { %2033 = vrot.lane.b32.xlu0 %v4103_v61, %s3918_s3 }
 0x579   :  { %2031 = vrot.lane.b32.xlu0 %v4119_v6, %s3918_s3 }
 0x5cf   :  { %v1652_v56 = vpop.xlane.xlu0 %1651 }
 0x5d0   :  { %v1662_v4 = vsub.f32 %v1646_v16, %v1652_v56 }
 0x5d2   :  { %v1666_v5 = vpack.c.bf16 %v1662_v4, %v1662_v4 }
 0x5d4   :  { %v1671_v37 = vmul.bf16 1069105081, %v1666_v5 }
 0x5d6   :  { %3696 = vpow.bf16 %v1671_v37 }
 0x5d7   :  { %v1658_v50 = vpop.xlane.xlu0 %1657 }
 0x5d8   :  { %v1664_v38 = vsub.f32 %v1648_v58, %v1658_v50  ;;  %v1655_v9 = vpop.xlane.xlu1 %1654 }
 0x5d9   :  { %v1663_v45 = vsub.f32 %v1647_v1, %v1655_v9 }
 0x5da   :  { %v1668_v46 = vpack.c.bf16 %v1664_v38, %v1664_v38 }
 0x5db   :  { %v1667_v60 = vpack.c.bf16 %v1663_v45, %v1663_v45 }
 0x5dc   :  { %v1677_v47 = vmul.bf16 1069105081, %v1668_v46  ;;  %v1799_v51 = vpop.permute.xlu1 %1798 }
 0x5dd   :  { %v1674_v20 = vmul.bf16 1069105081, %v1667_v60  ;;  %v1804_v16 = vsel %vm766_vm2, %v1799_v51, 0 }
 0x5de   :  { %3698 = vpow.bf16 %v1677_v47 }
 0x5df   :  { %3700 = vpow.bf16 %v1674_v20 }
 0x5e0   :  { %v1847_v61 = vpop.permute.xlu1 %1846  ;;  %v1661_v52 = vpop.xlane.xlu0 %1660 }
 0x5e1   :  { %v4404_v53 = vpop.eup %3696  ;;  %v1665_v6 = vsub.f32 %v1649_v25, %v1661_v52  ;;  %v1852_v13 = vsel %vm766_vm2, %v1847_v61, 0 }
 0x5e2   :  { %3485 = vmatmul.mubr.msk.bf16.vlgmr.msra.gmra.mrb[40].mxu1 %vm710_vm4, %v4404_v53 }
 0x5e3   :  { %v1669_v54 = vpack.c.bf16 %v1665_v6, %v1665_v6  ;;  %3495 = vmatpush3.bf16.msra.mxu1 %v1804_v16  ;;  %3496 = vmatprep.mubr.msk.bf16.mxu1 %vm3915_vm0, %v3914_v27 }
 0x5e4   :  { %v1984_v55 = vpop.permute.xlu1 %1983  ;;  %v1751_v58 = vpop.permute.xlu0 %1750  ;;  %3506 = vmatprep.subr.bf16.mxu1 %v3914_v27 }
 0x5e5   :  { %v1680_v63 = vmul.bf16 1069105081, %v1669_v54  ;;  %v1756_v1 = vsel %vm766_vm2, %v1751_v58, 0  ;;  %v1989_v19 = vsel %vm513_vm1, %v1984_v55, 0 }
 0x5e6   :  { %3489 = vmatpush3.bf16.msra.mxu0 %v1756_v1 }
 0x5e7   :  { %3702 = vpow.bf16 %v1680_v63  ;;  %3500 = vmatprep.subr.bf16.mxu0 %v3914_v27 }
 0x5e8   :  { %v1982_v2 = vpop.permute.xlu1 %1981  ;;  %v1934_v8 = vpop.permute.xlu0 %1933 }
 0x5e9   :  { %v4414_v10 = vpop.eup %3698  ;;  %v1939_v14 = vsel %vm513_vm1, %v1934_v8, 0 }
 0x5ea   :  { %v4416_v11 = vpop.eup %3700  ;;  %3497 = vmatmul.mubr.msk.bf16.vlgmr.msra.gmra.mrb[44].mxu1 %vm710_vm4, %v4414_v10 }
 0x5eb   :  { %3491 = vmatmul.mubr.msk.bf16.vlgmr.msra.gmra.mrb[52].mxu0 %vm710_vm4, %v4416_v11  ;;  %3508 = vmatprep.mubr.msk.bf16.mxu1 %vm3915_vm0, %v3914_v27 }
 0x5ec   :  { %3501 = vmatpush3.bf16.msra.mxu0 %v1852_v13  ;;  %v2084_v17 = vpop.permute.xlu1 %2083  ;;  %3507 = vmatpush3.bf16.xpose.msra.mxu1 %v1939_v14  ;;  %v1932_v24 = vpop.permute.xlu0 %1931 }
 0x5ed   :  { %3502 = vmatprep.mubr.msk.bf16.mxu0 %vm3915_vm0, %v3914_v27  ;;  %3512 = vmatprep.subr.bf16.mxu0 %v3914_v27  ;;  %v2089_v37 = vsel %vm513_vm1, %v2084_v17, 0 }
 0x5ee   :  { %3518 = vmatprep.subr.bf16.mxu1 %v3914_v27 }
 0x5f0   :  { %v2034_v25 = vpop.permute.xlu0 %2033  ;;  %v2082_v32 = vpop.permute.xlu1 %2081 }
 0x5f1   :  { %v2039_v34 = vsel %vm513_vm1, %v2034_v25, 0 }
 0x5f2   :  { %v4430_v26 = vpop.eup %3702 }
 0x5f3   :  { %3503 = vmatmul.mubr.msk.bf16.vlgmr.msra.gmra.mrb[56].mxu0 %vm710_vm4, %v4430_v26  ;;  %3509 = vmatmul.mubr.msk.bf16.vlgmr.msra.gmra.mrb[48].mxu1 %vm513_vm1, %v1932_v24 }
 0x5f4   :  { %3519 = vmatpush3.bf16.xpose.msra.mxu1 %v2039_v34  ;;  %3514 = vmatprep.mubr.msk.bf16.mxu0 %vm3915_vm0, %v3914_v27  ;;  %v2188_v56 = vpop.permute.xlu1 %2187  ;;  %v2032_v4 = vpop.permute.xlu0 %2031 }
 0x5f5   :  { %3513 = vmatpush3.bf16.xpose.msra.mxu0 %v1989_v19  ;;  %3520 = vmatprep.mubr.msk.bf16.mxu1 %vm3915_vm0, %v3914_v27  ;;  %v2193_v5 = vsel %vm766_vm2, %v2188_v56, 0 }
 0x5f6   :  { %3524 = vmatprep.subr.bf16.mxu0 %v3914_v27  ;;  %3530 = vmatprep.subr.bf16.mxu1 %v3914_v27 }
 0x5fb   :  { %3521 = vmatmul.mubr.msk.bf16.vlgmr.msra.gmra.mrb[52].mxu1 %vm513_vm1, %v2032_v4 }
 0x5fc   :  { %3515 = vmatmul.mubr.msk.bf16.vlgmr.msra.gmra.mrb[60].mxu0 %vm513_vm1, %v1982_v2  ;;  %3531 = vmatpush3.bf16.msra.mxu1 %v2193_v5 }
 0x5fd   :  { %3525 = vmatpush3.bf16.xpose.msra.mxu0 %v2089_v37  ;;  %3526 = vmatprep.mubr.msk.bf16.mxu0 %vm3915_vm0, %v3914_v27 }
 0x5fe   :  { %3532 = vmatprep.mubr.msk.bf16.mxu1 %vm3915_vm0, %v3914_v27  ;;  %3542 = vmatprep.subr.bf16.mxu1 %v3914_v27 }
 0x5ff   :  { %3536 = vmatprep.subr.bf16.mxu0 %v3914_v27 }
 0x604   :  { %3527 = vmatmul.mubr.msk.bf16.vlgmr.msra.gmra.mrb[64].mxu0 %vm513_vm1, %v2082_v32 }
 0x605   :  { %3538 = vmatprep.mubr.msk.bf16.mxu0 %vm3915_vm0, %v3914_v27 }
 0x6b5   :  { %v4456_v50 = vpop.f32.mrb[40].mxu1 }
 0x6b6   :  { %v3486_v38 = vpop.f32.mrb[41].mxu1 }
 0x6b7   :  { %v1747_v9 = vpop.f32.mrb[42].mxu1 }
 0x6b8   :  { %v3487_v45 = vpop.f32.mrb[43].mxu1 }
 0x6bd   :  { %v4458_v46 = vpop.f32.mrb[44].mxu1 }
 0x6be   :  { %v4460_v60 = vpop.f32.mrb[52].mxu0  ;;  %v3498_v47 = vpop.f32.mrb[45].mxu1 }
 0x6bf   :  { %v3492_v51 = vpop.f32.mrb[53].mxu0  ;;  %v1843_v20 = vpop.f32.mrb[46].mxu1 }
 0x6c0   :  { %v1795_v61 = vpop.f32.mrb[54].mxu0  ;;  %v3499_v52 = vpop.f32.mrb[47].mxu1  ;;  %v1198_v20 = vunpack.c.l.bf16 %v4320_v48 }
 0x6c1   :  { %v3493_v6 = vpop.f32.mrb[55].mxu0  ;;  %v1682_v61 = vunpack.c.l.bf16 %v4404_v53  ;;  %v1197_v52 = vunpack.c.l.bf16 %v4308_v33  ;;  %v1683_v53 = vunpack.c.l.bf16 %v4416_v11 }
 0x6c2   :  { %v1204_v62 = vsel %vm710_vm4, %v1198_v20, 0.0 }
 0x6c3   :  { %v1686_v6 = vsel %vm710_vm4, %v1682_v61, 0.0 }
 0x6c6   :  { %v4462_v16 = vpop.f32.mrb[56].mxu0  ;;  %v1975_v54 = vpop.f32.mrb[48].mxu1 }
 0x6c7   :  { %v2131_v55 = vsel %vm4155_vm3, %v1975_v54, -1000000.0  ;;  %v3504_v58 = vpop.f32.mrb[57].mxu0  ;;  %v3510_v63 = vpop.f32.mrb[49].mxu1  ;;  %v1201_v54 = vsel %vm710_vm4, %v1197_v52, 0.0  ;;  %v743_v52 = vunpack.c.l.bf16 %v4208_v35  ;;  %v744_v35 = vunpack.c.l.bf16 %v4223_v42 }
 0x6c8   :  { %v1891_v1 = vpop.f32.mrb[58].mxu0  ;;  %v1978_v2 = vpop.f32.mrb[50].mxu1  ;;  %v2135_v8 = vsel %vm710_vm4, %v2131_v55, -inf  ;;  %v1200_v58 = vunpack.c.l.bf16 %v4334_v57  ;;  %v1689_v63 = vsel %vm710_vm4, %v1683_v53, 0.0 }
 0x6c9   :  { %2136 = vmax.xlane.f32.xlu0 %v2135_v8  ;;  %v3505_v13 = vpop.f32.mrb[59].mxu0  ;;  %v3511_v14 = vpop.f32.mrb[51].mxu1 }
 0x6ca   :  { %v1210_v33 = vsel %vm710_vm4, %v1200_v58, 0.0  ;;  %v750_v58 = vsel %vm710_vm4, %v744_v35, 0.0 }
 0x6ce   :  { %v2075_v17 = vpop.f32.mrb[52].mxu1 }
 0x6cf   :  { %v2025_v24 = vpop.f32.mrb[60].mxu0  ;;  %v2133_v25 = vsel %vm4164_vm5, %v2075_v17, -1000000.0  ;;  %v3522_v32 = vpop.f32.mrb[53].mxu1 }
 0x6d0   :  { %v2132_v34 = vsel %vm4168_vm6, %v2025_v24, -1000000.0  ;;  %v3516_v29 = vpop.f32.mrb[61].mxu0  ;;  %v2078_v19 = vpop.f32.mrb[54].mxu1  ;;  %v2141_v56 = vsel %vm710_vm4, %v2133_v25, -inf }
 0x6d1   :  { %v2028_v4 = vpop.f32.mrb[62].mxu0  ;;  %2142 = vmax.xlane.f32.xlu0 %v2141_v56  ;;  %v3523_v5 = vpop.f32.mrb[55].mxu1  ;;  %v2138_v37 = vsel %vm710_vm4, %v2132_v34, -inf }
 0x6d2   :  { %2139 = vmax.xlane.f32.xlu1 %v2138_v37  ;;  %v3517_v38 = vpop.f32.mrb[63].mxu0 }
 0x6d7   :  { %v2125_v9 = vpop.f32.mrb[64].mxu0 }
 0x6d8   :  { %v2134_v41 = vsel %vm4179_vm7, %v2125_v9, -1000000.0  ;;  %v3528_v45 = vpop.f32.mrb[65].mxu0 }
 0x6d9   :  { %v2128_v47 = vpop.f32.mrb[66].mxu0  ;;  %v2144_v44 = vsel %vm710_vm4, %v2134_v41, -inf }
 0x6da   :  { %2145 = vmax.xlane.f32.xlu0 %v2144_v44  ;;  %v3529_v51 = vpop.f32.mrb[67].mxu0 }
 0x6e3   :  { %2283 = vrot.lane.b32.xlu1 %v4206_v30, %s3918_s3  ;;  %v1684_v30 = vunpack.c.l.bf16 %v4414_v10  ;;  %v1685_v10 = vunpack.c.l.bf16 %v4430_v26 }
 0x6e7   :  { %2331 = vrot.lane.b32.xlu1 %v4219_v28, %s3918_s3  ;;  %v1199_v28 = vunpack.c.l.bf16 %v4318_v18  ;;  %v1695_v18 = vsel %vm710_vm4, %v1685_v10, 0.0 }
 0x6e9   :  { %v1207_v48 = vsel %vm710_vm4, %v1199_v28, 0.0 }
 0x6f0   :  { %2235 = vrot.lane.b32.xlu0 %v4145_v21, %s3918_s3  ;;  %v1692_v21 = vsel %vm710_vm4, %v1684_v30, 0.0  ;;  %v745_v30 = vunpack.c.l.bf16 %v4221_v39 }
 0x70b   :  { %1205 = vadd.xlane.f32.xlu1 %v1204_v62 }
 0x70f   :  { %1687 = vadd.xlane.f32.xlu1 %v1686_v6  ;;  %1202 = vadd.xlane.f32.xlu0 %v1201_v54  ;;  %v747_v54 = vsel %vm710_vm4, %v743_v52, 0.0 }
 0x713   :  { %1693 = vadd.xlane.f32.xlu1 %v1692_v21  ;;  %1208 = vadd.xlane.f32.xlu0 %v1207_v48  ;;  %v753_v48 = vsel %vm710_vm4, %v745_v30, 0.0 }
 0x717   :  { %1211 = vadd.xlane.f32.xlu0 %v1210_v33  ;;  %v746_v33 = vunpack.c.l.bf16 %v4238_v49 }
 0x719   :  { %v756_v39 = vsel %vm710_vm4, %v746_v33, 0.0 }
 0x71b   :  { %1690 = vadd.xlane.f32.xlu0 %v1689_v63 }
 0x71f   :  { %1696 = vadd.xlane.f32.xlu0 %v1695_v18 }
 0x756   :  { %v2137_v1 = vpop.xlane.xlu0 %2136 }
 0x757   :  { %v2147_v2 = vsub.f32 %v2131_v55, %v2137_v1 }
 0x759   :  { %v2151_v8 = vpack.c.bf16 %v2147_v2, %v2147_v2 }
 0x75b   :  { %v2156_v13 = vmul.bf16 1069105081, %v2151_v8 }
 0x75d   :  { %3704 = vpow.bf16 %v2156_v13 }
 0x75e   :  { %v2143_v57 = vpop.xlane.xlu0 %2142 }
 0x75f   :  { %v2149_v14 = vsub.f32 %v2133_v25, %v2143_v57  ;;  %v2140_v17 = vpop.xlane.xlu1 %2139 }
 0x760   :  { %v2148_v24 = vsub.f32 %v2132_v34, %v2140_v17 }
 0x761   :  { %v2153_v32 = vpack.c.bf16 %v2149_v14, %v2149_v14 }
 0x762   :  { %v2152_v11 = vpack.c.bf16 %v2148_v24, %v2148_v24 }
 0x763   :  { %v2162_v29 = vmul.bf16 1069105081, %v2153_v32  ;;  %v2284_v26 = vpop.permute.xlu1 %2283 }
 0x764   :  { %v2159_v19 = vmul.bf16 1069105081, %v2152_v11  ;;  %v2289_v37 = vsel %vm766_vm2, %v2284_v26, 0 }
 0x765   :  { %3706 = vpow.bf16 %v2162_v29 }
 0x766   :  { %3708 = vpow.bf16 %v2159_v19 }
 0x767   :  { %v2146_v56 = vpop.xlane.xlu0 %2145 }
 0x768   :  { %v3705_v4 = vpop.eup %3704  ;;  %v2150_v5 = vsub.f32 %v2134_v41, %v2146_v56  ;;  %v2332_v41 = vpop.permute.xlu1 %2331 }
 0x769   :  { %3533 = vmatmul.mubr.msk.bf16.vlgmr.msra.gmra.mrb[56].mxu1 %vm710_vm4, %v3705_v4  ;;  %v2167_v55 = vunpack.c.l.bf16 %v3705_v4  ;;  %v2337_v20 = vsel %vm766_vm2, %v2332_v41, 0 }
 0x76a   :  { %v2154_v38 = vpack.c.bf16 %v2150_v5, %v2150_v5  ;;  %3543 = vmatpush3.bf16.msra.mxu1 %v2289_v37  ;;  %3544 = vmatprep.mubr.msk.bf16.mxu1 %vm3915_vm0, %v3914_v27 }
 0x76b   :  { %v2236_v25 = vpop.permute.xlu0 %2235  ;;  %v2171_v34 = vsel %vm710_vm4, %v2167_v55, 0.0 }
 0x76c   :  { %v2165_v9 = vmul.bf16 1069105081, %v2154_v38  ;;  %v2241_v45 = vsel %vm766_vm2, %v2236_v25, 0  ;;  %2172 = vadd.xlane.f32.xlu1 %v2171_v34 }
 0x76d   :  { %3537 = vmatpush3.bf16.msra.mxu0 %v2241_v45  ;;  %v3629_v45 = vld [vmem:[#allocation8 + $0x8] sm:$0xff]  }
 0x76e   :  { %3710 = vpow.bf16 %v2165_v9  ;;  %3548 = vmatprep.subr.bf16.mxu0 %v3914_v27  ;;  %v3628_v9 = vld [vmem:[#allocation8] sm:$0xff]  }
 0x76f   :  { %3554 = vmatprep.subr.bf16.mxu1 %v3628_v9 }
 0x770   :  { %v3707_v47 = vpop.eup %3706 }
 0x771   :  { %v3709_v44 = vpop.eup %3708  ;;  %3545 = vmatmul.mubr.msk.bf16.vlgmr.msra.gmra.mrb[60].mxu1 %vm710_vm4, %v3707_v47  ;;  %v2169_v51 = vunpack.c.l.bf16 %v3707_v47 }
 0x772   :  { %3539 = vmatmul.mubr.msk.bf16.vlgmr.msra.gmra.mrb[68].mxu0 %vm710_vm4, %v3709_v44  ;;  %v2168_v62 = vunpack.c.l.bf16 %v3709_v44  ;;  %3555 = vmatpush3.bf16.msra.mxu1 %v3628_v9 }
 0x773   :  { %3549 = vmatpush3.bf16.msra.mxu0 %v2337_v20  ;;  %v2177_v61 = vsel %vm710_vm4, %v2169_v51, 0.0  ;;  %3550 = vmatprep.mubr.msk.bf16.mxu0 %vm3915_vm0, %v3914_v27 }
 0x774   :  { %2178 = vadd.xlane.f32.xlu1 %v2177_v61  ;;  %v2174_v6 = vsel %vm710_vm4, %v2168_v62, 0.0  ;;  %3556 = vmatprep.subr.bf16.mxu1 %v3629_v45 }
 0x775   :  { %2175 = vadd.xlane.f32.xlu0 %v2174_v6 }
 0x776   :  { %3557 = vmatpush3.bf16.msra.mxu1 %v3629_v45 }
 0x778   :  { %748 = vadd.xlane.f32.xlu1 %v747_v54 }
 0x779   :  { %v3711_v28 = vpop.eup %3710 }
 0x77a   :  { %3551 = vmatmul.mubr.msk.bf16.vlgmr.msra.gmra.mrb[72].mxu0 %vm710_vm4, %v3711_v28  ;;  %v2170_v21 = vunpack.c.l.bf16 %v3711_v28 }
 0x77b   :  { %2765 = vmatprep.mubr.bf16.mxu0 %v3913_v0 }
 0x77c   :  { %754 = vadd.xlane.f32.xlu1 %v753_v48  ;;  %v2180_v27 = vsel %vm710_vm4, %v2170_v21, 0.0 }
 0x77d   :  { %2181 = vadd.xlane.f32.xlu0 %v2180_v27 }
 0x781   :  { %751 = vadd.xlane.f32.xlu0 %v750_v58 }
 0x785   :  { %757 = vadd.xlane.f32.xlu0 %v756_v39 }
 0x798   :  { %v1206_v53 = vpop.xlane.xlu1 %1205 }
 0x799   :  { %3712 = vrcp.f32 %v1206_v53 }
 0x79c   :  { %v1688_v63 = vpop.xlane.xlu1 %1687  ;;  %v1203_v10 = vpop.xlane.xlu0 %1202 }
 0x79d   :  { %3714 = vrcp.f32 %v1688_v63 }
 0x79e   :  { %3716 = vrcp.f32 %v1203_v10  ;;  %v3630_v10 = vld [vmem:[#allocation8 + $0x10] sm:$0xff]  }
 0x79f   :  { %3558 = vmatprep.subr.bf16.mxu1 %v3630_v10 }
 0x7a0   :  { %v1694_v18 = vpop.xlane.xlu1 %1693  ;;  %v1209_v1 = vpop.xlane.xlu0 %1208  ;;  %3559 = vmatpush3.bf16.msra.mxu1 %v3630_v10  ;;  %v3640_v10 = vld [vmem:[#allocation9 + $0x4] ss:$8 sps:$4 sm:$0xff]  }
 0x7a1   :  { %3718 = vrcp.f32 %v1694_v18  ;;  %v3631_v18 = vld [vmem:[#allocation8 + $0x18] sm:$0xff]   ;;  %2733 = vmatprep.subr.bf16.mxu0 %v3640_v10 }
 0x7a2   :  { %3720 = vrcp.f32 %v1209_v1  ;;  %3560 = vmatprep.subr.bf16.mxu1 %v3631_v18 }
 0x7a3   :  { %v3713_v42 = vpop.eup %3712 }
 0x7a4   :  { %v1212_v2 = vpop.xlane.xlu0 %1211  ;;  %v1410_v8 = vmul.f32 %v3713_v42, %v4364_v23  ;;  %3561 = vmatpush3.bf16.msra.mxu1 %v3631_v18  ;;  %v3643_v18 = vld [vmem:[#allocation9 + $0x14] ss:$8 sps:$4 sm:$0xff]  }
 0x7a5   :  { %3722 = vrcp.f32 %v1212_v2 }
 0x7a6   :  { %v3219_v49 = vpack.c.bf16 %v1410_v8, %v1410_v8 }
 0x7a7   :  { %v3715_v13 = vpop.eup %3714 }
 0x7a8   :  { %v3717_v57 = vpop.eup %3716  ;;  %1431 = vrot.lane.b32.xlu0 %v3219_v49, %s3918_s3  ;;  %v1691_v14 = vpop.xlane.xlu0 %1690  ;;  %v1894_v17 = vmul.f32 %v3715_v13, %v4456_v50  ;;  %v3632_v49 = vld [vmem:[#allocation8 + $0x20] sm:$0xff]   ;;  %v3633_v13 = vld [vmem:[#allocation8 + $0x28] sm:$0xff]  }
 0x7a9   :  { %3724 = vrcp.f32 %v1691_v14  ;;  %v1409_v24 = vmul.f32 %v3717_v57, %v4360_v12  ;;  %3562 = vmatprep.subr.bf16.mxu1 %v3632_v49 }
 0x7aa   :  { %v3222_v32 = vpack.c.bf16 %v1894_v17, %v1894_v17  ;;  %3563 = vmatpush3.bf16.msra.mxu1 %v3632_v49 }
 0x7ab   :  { %v3719_v11 = vpop.eup %3718  ;;  %v3218_v29 = vpack.c.bf16 %v1409_v24, %v1409_v24  ;;  %3564 = vmatprep.subr.bf16.mxu1 %v3633_v13 }
 0x7ac   :  { %v3721_v19 = vpop.eup %3720  ;;  %1914 = vrot.lane.b32.xlu0 %v3222_v32, %s3909_s8  ;;  %v1697_v26 = vpop.xlane.xlu0 %1696  ;;  %v1896_v23 = vmul.f32 %v3719_v11, %v4458_v46 }
 0x7ad   :  { %1429 = vrot.lane.b32.xlu1 %v3218_v29, %s3918_s3  ;;  %3726 = vrcp.f32 %v1697_v26  ;;  %v1411_v56 = vmul.f32 %v3721_v19, %v4362_v22 }
 0x7ae   :  { %v3224_v4 = vpack.c.bf16 %v1896_v23, %v1896_v23  ;;  %3565 = vmatpush3.bf16.msra.mxu1 %v3633_v13  ;;  %v3634_v23 = vld [vmem:[#allocation8 + $0x30] sm:$0xff]  }
 0x7af   :  { %v3723_v5 = vpop.eup %3722  ;;  %v3220_v50 = vpack.c.bf16 %v1411_v56, %v1411_v56  ;;  %3566 = vmatprep.subr.bf16.mxu1 %v3634_v23 }
 0x7b0   :  { %1918 = vrot.lane.b32.xlu0 %v3224_v4, %s3909_s8  ;;  %v1412_v12 = vmul.f32 %v3723_v5, %v4366_v36 }
 0x7b1   :  { %1433 = vrot.lane.b32.xlu1 %v3220_v50, %s3918_s3  ;;  %v3636_v50 = vld [vmem:[#allocation8 + $0x38] sm:$0xff]  }
 0x7b2   :  { %v3221_v37 = vpack.c.bf16 %v1412_v12, %v1412_v12  ;;  %3567 = vmatpush3.bf16.msra.mxu1 %v3634_v23 }
 0x7b3   :  { %v3725_v55 = vpop.eup %3724  ;;  %3568 = vmatprep.subr.bf16.mxu1 %v3636_v50 }
 0x7b4   :  { %v1895_v38 = vmul.f32 %v3725_v55, %v4460_v60 }
 0x7b5   :  { %1435 = vrot.lane.b32.xlu1 %v3221_v37, %s3918_s3 }
 0x7b6   :  { %v3223_v46 = vpack.c.bf16 %v1895_v38, %v1895_v38  ;;  %3569 = vmatpush3.bf16.msra.mxu1 %v3636_v50  ;;  %v3649_v50 = vld [vmem:[#allocation9 + $0x34] ss:$8 sps:$4 sm:$0xff]  }
 0x7b7   :  { %v3727_v25 = vpop.eup %3726 }
 0x7b8   :  { %v1897_v34 = vmul.f32 %v3727_v25, %v4462_v16 }
 0x7b9   :  { %1916 = vrot.lane.b32.xlu1 %v3223_v46, %s3909_s8 }
 0x7ba   :  { %v3225_v22 = vpack.c.bf16 %v1897_v34, %v1897_v34 }
 0x7bd   :  { %1920 = vrot.lane.b32.xlu1 %v3225_v22, %s3909_s8 }
 0x7f9   :  { %v2173_v36 = vpop.xlane.xlu1 %2172 }
 0x801   :  { %v2179_v41 = vpop.xlane.xlu1 %2178 }
 0x802   :  { %v2176_v47 = vpop.xlane.xlu0 %2175 }
 0x805   :  { %v749_v60 = vpop.xlane.xlu1 %748 }
 0x806   :  { %3728 = vrcp.f32 %v749_v60 }
 0x809   :  { %v755_v44 = vpop.xlane.xlu1 %754 }
 0x80a   :  { %3730 = vrcp.f32 %v755_v44  ;;  %v2182_v51 = vpop.xlane.xlu0 %2181 }
 0x80e   :  { %v752_v16 = vpop.xlane.xlu0 %751 }
 0x80f   :  { %3732 = vrcp.f32 %v752_v16 }
 0x810   :  { %v3729_v20 = vpop.eup %3728 }
 0x811   :  { %v948_v62 = vmul.f32 %v3729_v20, %v4264_v59 }
 0x812   :  { %v758_v61 = vpop.xlane.xlu0 %757 }
 0x813   :  { %3734 = vrcp.f32 %v758_v61  ;;  %v952_v52 = vpack.c.bf16 %v948_v62, %v948_v62  ;;  %v3158_v62 = vld [vmem:[%s4640_s5] ss:$0 sm:$0xff] }
 0x814   :  { %v3731_v6 = vpop.eup %3730  ;;  %3736 = vrcp.f32 %v2173_v36 }
 0x815   :  { %v950_v54 = vmul.f32 %v3731_v6, %v4266_v3  ;;  %957 = vst.msk [vmem:[#allocation2] sm:$0xf] %vm956_vm8, %v952_v52  ;;  %3738 = vrcp.f32 %v2179_v41  ;;  %v3760_v52 = vld [vmem:[#allocation3] sm:$0xff]  }
 0x816   :  { %3740 = vrcp.f32 %v2176_v47  ;;  %v121_v6 = vunpack.c.l.bf16 %v3760_v52 }
 0x817   :  { %v954_v30 = vpack.c.bf16 %v950_v54, %v950_v54  ;;  %3742 = vrcp.f32 %v2182_v51 }
 0x819   :  { %v3733_v28 = vpop.eup %3732  ;;  %959 = vst.msk [vmem:[#allocation2 + $0x8] sm:$0xf] %vm956_vm8, %v954_v30 }
 0x81a   :  { %v949_v21 = vmul.f32 %v3733_v28, %v4268_v7  ;;  %v1432_v48 = vpop.permute.xlu0 %1431 }
 0x81c   :  { %v953_v27 = vpack.c.bf16 %v949_v21, %v949_v21  ;;  %v122_v21 = vunpack.c.h.bf16 %v3760_v52 }
 0x81d   :  { %v3735_v35 = vpop.eup %3734 }
 0x81e   :  { %v951_v59 = vmul.f32 %v3735_v35, %v4270_v15  ;;  %958 = vst.msk [vmem:[#allocation2 + $0x4] sm:$0xf] %vm956_vm8, %v953_v27  ;;  %v1915_v58 = vpop.permute.xlu0 %1914  ;;  %v3737_v1 = vpop.eup %3736 }
 0x81f   :  { %1443 = vst.msk [vmem:[#allocation2 + $0x4] sm:$0xf] %vm1441_vm9, %v1432_v48  ;;  %v1430_v3 = vpop.permute.xlu1 %1429  ;;  %v3739_v24 = vpop.eup %3738 }
 0x820   :  { %1442 = vst.msk [vmem:[#allocation2] sm:$0xf] %vm1441_vm9, %v1430_v3  ;;  %v955_v33 = vpack.c.bf16 %v951_v59, %v951_v59  ;;  %v3741_v11 = vpop.eup %3740 }
 0x821   :  { %1927 = vst.msk [vmem:[#allocation2] sm:$0xf] %vm1926_vm10, %v1915_v58  ;;  %v3743_v25 = vpop.eup %3742  ;;  %v3761_v58 = vld [vmem:[#allocation3 + $0x8] sm:$0xff]  }
 0x822   :  { %v1919_v39 = vpop.permute.xlu0 %1918  ;;  %960 = vst.msk [vmem:[#allocation2 + $0xc] sm:$0xf] %vm956_vm8, %v955_v33  ;;  %v123_v3 = vunpack.c.l.bf16 %v3761_v58 }
 0x823   :  { %v1434_v7 = vpop.permute.xlu1 %1433 }
 0x824   :  { %1444 = vst.msk [vmem:[#allocation2 + $0x8] sm:$0xf] %vm1441_vm9, %v1434_v7 }
 0x825   :  { %1929 = vst.msk [vmem:[#allocation2 + $0x8] sm:$0xf] %vm1926_vm10, %v1919_v39 }
 0x827   :  { %v1436_v15 = vpop.permute.xlu1 %1435 }
 0x828   :  { %1445 = vst.msk [vmem:[#allocation2 + $0xc] sm:$0xf] %vm1441_vm9, %v1436_v15  ;;  %v124_v15 = vunpack.c.h.bf16 %v3761_v58 }
 0x82b   :  { %v1917_v53 = vpop.permute.xlu1 %1916 }
 0x82c   :  { %1928 = vst.msk [vmem:[#allocation2 + $0x4] sm:$0xf] %vm1926_vm10, %v1917_v53 }
 0x82f   :  { %v1921_v63 = vpop.permute.xlu1 %1920 }
 0x830   :  { %1930 = vst.msk [vmem:[#allocation2 + $0xc] sm:$0xf] %vm1926_vm10, %v1921_v63  ;;  %v3638_v63 = vld [vmem:[#allocation9] ss:$8 sps:$4 sm:$0xff]  }
 0x831   :  { %2734 = vmatpush1.bf16.msra.mxu0 %v3638_v63 }
 0x832   :  { %2735 = vmatprep.subr.bf16.mxu0 %v3643_v18  ;;  %v3170_v18 = vld [vmem:[%s4642_s7] ss:$0 sm:$0xff] }
 0x83c   :  { %v2229_v42 = vpop.f32.mrb[56].mxu1 }
 0x83d   :  { %v2379_v2 = vmul.f32 %v3737_v1, %v2229_v42  ;;  %v3534_v8 = vpop.f32.mrb[57].mxu1  ;;  %v3641_v1 = vld [vmem:[#allocation9 + $0x10] ss:$8 sps:$4 sm:$0xff]  }
 0x83e   :  { %v2232_v57 = vpop.f32.mrb[58].mxu1  ;;  %2736 = vmatpush1.bf16.msra.mxu0 %v3641_v1 }
 0x83f   :  { %v3226_v14 = vpack.c.bf16 %v2379_v2, %v2379_v2  ;;  %v3535_v17 = vpop.f32.mrb[59].mxu1 }
 0x841   :  { %2399 = vrot.lane.b32.xlu0 %v3226_v14, %s3917_s1 }
 0x844   :  { %v2325_v32 = vpop.f32.mrb[60].mxu1 }
 0x845   :  { %v2277_v29 = vpop.f32.mrb[68].mxu0  ;;  %v2381_v19 = vmul.f32 %v3739_v24, %v2325_v32  ;;  %v3546_v26 = vpop.f32.mrb[61].mxu1 }
 0x846   :  { %v2380_v56 = vmul.f32 %v3741_v11, %v2277_v29  ;;  %v3540_v4 = vpop.f32.mrb[69].mxu0  ;;  %v2328_v5 = vpop.f32.mrb[62].mxu1 }
 0x847   :  { %v3228_v12 = vpack.c.bf16 %v2381_v19, %v2381_v19  ;;  %v2280_v37 = vpop.f32.mrb[70].mxu0  ;;  %v3547_v55 = vpop.f32.mrb[63].mxu1  ;;  %v3646_v4 = vld [vmem:[#allocation9 + $0x24] ss:$8 sps:$4 sm:$0xff]   ;;  %v3644_v5 = vld [vmem:[#allocation9 + $0x20] ss:$8 sps:$4 sm:$0xff]  }
 0x848   :  { %v3227_v38 = vpack.c.bf16 %v2380_v56, %v2380_v56  ;;  %v3541_v46 = vpop.f32.mrb[71].mxu0  ;;  %2737 = vmatprep.subr.bf16.mxu0 %v3646_v4  ;;  %v3652_v37 = vld [vmem:[#allocation9 + $0x44] ss:$8 sps:$4 sm:$0xff]   ;;  %v3650_v55 = vld [vmem:[#allocation9 + $0x40] ss:$8 sps:$4 sm:$0xff]  }
 0x849   :  { %2403 = vrot.lane.b32.xlu0 %v3228_v12, %s3917_s1  ;;  %2738 = vmatpush1.bf16.msra.mxu0 %v3644_v5  ;;  %v3647_v12 = vld [vmem:[#allocation9 + $0x30] ss:$8 sps:$4 sm:$0xff]  }
 0x84a   :  { %2401 = vrot.lane.b32.xlu1 %v3227_v38, %s3917_s1  ;;  %2739 = vmatprep.subr.bf16.mxu0 %v3649_v50  ;;  %v3655_v38 = vld [vmem:[#allocation9 + $0x54] ss:$8 sps:$4 sm:$0xff]   ;;  %v3653_v46 = vld [vmem:[#allocation9 + $0x50] ss:$8 sps:$4 sm:$0xff]  }
 0x84d   :  { %v2373_v34 = vpop.f32.mrb[72].mxu0  ;;  %2740 = vmatpush1.bf16.msra.mxu0 %v3647_v12 }
 0x84e   :  { %v2382_v22 = vmul.f32 %v3743_v25, %v2373_v34  ;;  %v3552_v9 = vpop.f32.mrb[73].mxu0  ;;  %2741 = vmatprep.subr.bf16.mxu0 %v3652_v37  ;;  %v3658_v25 = vld [vmem:[#allocation9 + $0x64] ss:$8 sps:$4 sm:$0xff]   ;;  %v3656_v34 = vld [vmem:[#allocation9 + $0x60] ss:$8 sps:$4 sm:$0xff]  }
 0x84f   :  { %v2376_v45 = vpop.f32.mrb[74].mxu0  ;;  %v3659_v9 = vld [vmem:[#allocation9 + $0x70] ss:$8 sps:$4 sm:$0xff]  }
 0x850   :  { %v3229_v36 = vpack.c.bf16 %v2382_v22, %v2382_v22  ;;  %v3553_v41 = vpop.f32.mrb[75].mxu0  ;;  %v3661_v22 = vld [vmem:[#allocation9 + $0x74] ss:$8 sps:$4 sm:$0xff]   ;;  %v3662_v45 = vld [vmem:[#allocation11 + $0x40] sm:$0xff]  }
 0x851   :  { %2742 = vmatpush1.bf16.msra.mxu0 %v3650_v55  ;;  %v3664_v41 = vld [vmem:[#allocation11 + $0x48] sm:$0xff]   ;;  %3314 = vmatprep.subr.bf16.mxu1 %v3662_v45 }
 0x852   :  { %2405 = vrot.lane.b32.xlu1 %v3229_v36, %s3917_s1  ;;  %2743 = vmatprep.subr.bf16.mxu0 %v3655_v38  ;;  %v3663_v36 = vld [vmem:[#allocation11] sm:$0xff]  }
 0x855   :  { %2744 = vmatpush1.bf16.msra.mxu0 %v3653_v46 }
 0x856   :  { %2745 = vmatprep.subr.bf16.mxu0 %v3658_v25 }
 0x859   :  { %2746 = vmatpush1.bf16.msra.mxu0 %v3656_v34 }
 0x85a   :  { %2747 = vmatprep.subr.bf16.mxu0 %v3661_v22 }
 0x85d   :  { %2748 = vmatpush1.bf16.msra.mxu0 %v3659_v9 }
 0x8b3   :  { %v2400_v60 = vpop.permute.xlu0 %2399 }
 0x8b4   :  { %2412 = vst.msk [vmem:[#allocation2] sm:$0xf] %vm2411_vm11, %v2400_v60  ;;  %v3665_v60 = vld [vmem:[#allocation11 + $0x8] sm:$0xff]  }
 0x8bb   :  { %v2404_v47 = vpop.permute.xlu0 %2403 }
 0x8bc   :  { %2414 = vst.msk [vmem:[#allocation2 + $0x8] sm:$0xf] %vm2411_vm11, %v2404_v47  ;;  %v2402_v44 = vpop.permute.xlu1 %2401  ;;  %v3666_v47 = vld [vmem:[#allocation11 + $0x50] sm:$0xff]  }
 0x8bd   :  { %2413 = vst.msk [vmem:[#allocation2 + $0x4] sm:$0xf] %vm2411_vm11, %v2402_v44  ;;  %v3667_v44 = vld [vmem:[#allocation11 + $0x10] sm:$0xff]  }
 0x8c4   :  { %v2406_v51 = vpop.permute.xlu1 %2405  ;;  %v3635_v16 = vld [vmem:[#allocation2] sm:$0xff]  }
 0x8c5   :  { %2415 = vst.msk [vmem:[#allocation2 + $0xc] sm:$0xf] %vm2411_vm11, %v2406_v51  ;;  %3570 = vmatprep.mubr.bf16.mxu1 %v3635_v16  ;;  %v3668_v51 = vld [vmem:[#allocation11 + $0x58] sm:$0xff]  }
 0x8c6   :  { %v3669_v16 = vld [vmem:[#allocation11 + $0x18] sm:$0xff]  }
 0x8cc   :  { %v3637_v20 = vld [vmem:[#allocation2 + $0x8] sm:$0xff]  }
 0x8cd   :  { %3571 = vmatmul.mubr.bf16.vlgmr.msra.gmra.mrb[64].mxu1 %v3637_v20  ;;  %v3670_v20 = vld [vmem:[#allocation11 + $0x60] sm:$0xff]  }
 0x8ce   :  { %3315 = vmatpush3.bf16.msra.mxu1 %v3663_v36 }
 0x8cf   :  { %3316 = vmatprep.subr.bf16.mxu1 %v3664_v41 }
 0x8d2   :  { %3317 = vmatpush3.bf16.msra.mxu1 %v3665_v60 }
 0x8d3   :  { %3318 = vmatprep.subr.bf16.mxu1 %v3666_v47 }
 0x8d6   :  { %3319 = vmatpush3.bf16.msra.mxu1 %v3667_v44 }
 0x8d7   :  { %3320 = vmatprep.subr.bf16.mxu1 %v3668_v51 }
 0x8da   :  { %3321 = vmatpush3.bf16.msra.mxu1 %v3669_v16 }
 0x8db   :  { %3322 = vmatprep.subr.bf16.mxu1 %v3670_v20 }
 0x9a0   :  { %v3572_v61 = vpop.f32.mrb[64].mxu1 }
 0x9a1   :  { %v2537_v54 = vpop.f32.mrb[65].mxu1  ;;  %v2546_v27 = vadd.f32 %v3572_v61, %v3158_v62  ;;  %v3672_v61 = vld [vmem:[#allocation11 + $0x68] sm:$0xff]  }
 0x9a2   :  { %v2538_v30 = vadd.f32 %v3158_v62, %v2537_v54  ;;  %v3573_v28 = vpop.f32.mrb[66].mxu1 }
 0x9a3   :  { %v2540_v48 = vpop.f32.mrb[67].mxu1  ;;  %v2549_v39 = vadd.f32 %v3573_v28, %v3158_v62  ;;  %v2554_v7 = vadd.f32 %v2546_v27, %v123_v3 }
 0x9a4   :  { %v2541_v35 = vadd.f32 %v3158_v62, %v2540_v48  ;;  %v2552_v59 = vadd.f32 %v2538_v30, %v121_v6  ;;  %v3671_v62 = vld [vmem:[#allocation11 + $0x20] sm:$0xff]  }
 0x9a5   :  { %v2555_v53 = vadd.f32 %v2549_v39, %v124_v15  ;;  %3323 = vmatpush3.bf16.msra.mxu1 %v3671_v62  ;;  %v3169_v39 = vld [vmem:[%s4641_s6] ss:$0 sm:$0xff] }
 0x9a6   :  { %2558 = vadd.xlane.f32.xlu0 %v2552_v59  ;;  %v2553_v33 = vadd.f32 %v2541_v35, %v122_v21  ;;  %3324 = vmatprep.subr.bf16.mxu1 %v3672_v61 }
 0x9a8   :  { %2560 = vadd.xlane.f32.xlu1 %v2553_v33 }
 0x9aa   :  { %2562 = vadd.xlane.f32.xlu0 %v2554_v7 }
 0x9ae   :  { %2564 = vadd.xlane.f32.xlu0 %v2555_v53 }
 0xa33   :  { %v2559_v42 = vpop.xlane.xlu0 %2558 }
 0xa34   :  { %v2567_v2 = vmul.f32 0.0078125, %v2559_v42 }
 0xa35   :  { %v2561_v8 = vpop.xlane.xlu1 %2560 }
 0xa36   :  { %v4562_v49 = vsub.f32 %v2552_v59, %v2567_v2  ;;  %v2568_v13 = vmul.f32 0.0078125, %v2561_v8 }
 0xa37   :  { %v2563_v57 = vpop.xlane.xlu0 %2562 }
 0xa38   :  { %v4564_v14 = vsub.f32 %v2553_v33, %v2568_v13  ;;  %v2569_v17 = vmul.f32 0.0078125, %v2563_v57  ;;  %v2575_v24 = vmul.f32 %v4562_v49, %v4562_v49 }
 0xa3a   :  { %v4568_v32 = vsub.f32 %v2554_v7, %v2569_v17  ;;  %2579 = vadd.xlane.f32.xlu1 %v2575_v24  ;;  %v2576_v11 = vmul.f32 %v4564_v14, %v4564_v14 }
 0xa3b   :  { %v2565_v29 = vpop.xlane.xlu0 %2564 }
 0xa3c   :  { %v2570_v19 = vmul.f32 0.0078125, %v2565_v29  ;;  %2581 = vadd.xlane.f32.xlu0 %v2576_v11  ;;  %v2577_v26 = vmul.f32 %v4568_v32, %v4568_v32 }
 0xa3e   :  { %v4574_v23 = vsub.f32 %v2555_v53, %v2570_v19  ;;  %2583 = vadd.xlane.f32.xlu1 %v2577_v26  ;;  %v3674_v19 = vld [vmem:[#allocation11 + $0x70] sm:$0xff]  }
 0xa3f   :  { %v3675_v26 = vld [vmem:[#allocation11 + $0x30] sm:$0xff]  }
 0xa40   :  { %v2578_v56 = vmul.f32 %v4574_v23, %v4574_v23 }
 0xa42   :  { %2585 = vadd.xlane.f32.xlu0 %v2578_v56  ;;  %v3677_v56 = vld [vmem:[#allocation11 + $0x38] sm:$0xff]  }
 0xac7   :  { %v2580_v52 = vpop.xlane.xlu1 %2579 }
 0xac8   :  { %v2587_v6 = vmul.f32 0.0078125, %v2580_v52 }
 0xac9   :  { %v2582_v54 = vpop.xlane.xlu0 %2581 }
 0xaca   :  { %v2591_v30 = vadd.f32 1e-05, %v2587_v6  ;;  %v2588_v28 = vmul.f32 0.0078125, %v2582_v54 }
 0xacb   :  { %v2584_v21 = vpop.xlane.xlu1 %2583 }
 0xacc   :  { %3744 = vrsqrt.f32 %v2591_v30  ;;  %v2592_v48 = vadd.f32 1e-05, %v2588_v28  ;;  %v2589_v27 = vmul.f32 0.0078125, %v2584_v21  ;;  %v3187_v21 = vld [vmem:[%s4646_s11] ss:$0 sm:$0xff] }
 0xace   :  { %3746 = vrsqrt.f32 %v2592_v48  ;;  %v2593_v35 = vadd.f32 1e-05, %v2589_v27 }
 0xacf   :  { %v2586_v59 = vpop.xlane.xlu0 %2585 }
 0xad0   :  { %3748 = vrsqrt.f32 %v2593_v35  ;;  %v2590_v58 = vmul.f32 0.0078125, %v2586_v59 }
 0xad2   :  { %v2594_v3 = vadd.f32 1e-05, %v2590_v58 }
 0xad4   :  { %3750 = vrsqrt.f32 %v2594_v3 }
 0xad6   :  { %v3745_v33 = vpop.eup %3744 }
 0xad7   :  { %v2599_v7 = vmul.f32 %v3745_v33, %v4562_v49 }
 0xad8   :  { %v3747_v15 = vpop.eup %3746 }
 0xad9   :  { %v2600_v53 = vmul.f32 %v3747_v15, %v4564_v14  ;;  %v2609_v63 = vmul.f32 %v3169_v39, %v2599_v7 }
 0xada   :  { %v3749_v10 = vpop.eup %3748 }
 0xadb   :  { %v2610_v1 = vmul.f32 %v3169_v39, %v2600_v53  ;;  %v4586_v42 = vadd.f32 %v3170_v18, %v2609_v63  ;;  %v2601_v8 = vmul.f32 %v3749_v10, %v4568_v32  ;;  %v3673_v32 = vld [vmem:[#allocation11 + $0x28] sm:$0xff]  }
 0xadc   :  { %3325 = vmatpush3.bf16.msra.mxu1 %v3673_v32 }
 0xadd   :  { %v4588_v2 = vadd.f32 %v3170_v18, %v2610_v1  ;;  %v2611_v14 = vmul.f32 %v3169_v39, %v2601_v8  ;;  %3326 = vmatprep.subr.bf16.mxu1 %v3674_v19 }
 0xade   :  { %v3751_v13 = vpop.eup %3750 }
 0xadf   :  { %v2623_v49 = vpack.c.bf16 %v4588_v2, %v4586_v42  ;;  %v2602_v57 = vmul.f32 %v3751_v13, %v4574_v23  ;;  %v4597_v11 = vadd.f32 %v3170_v18, %v2611_v14  ;;  %v3676_v23 = vld [vmem:[#allocation11 + $0x78] sm:$0xff]  }
 0xae0   :  { %3327 = vmatpush3.bf16.msra.mxu1 %v3675_v26 }
 0xae1   :  { %2766 = vmatmul.mubr.bf16.vlgmr.msra.gmra.mrb[76].mxu0 %v2623_v49  ;;  %v2612_v17 = vmul.f32 %v3169_v39, %v2602_v57  ;;  %3328 = vmatprep.subr.bf16.mxu1 %v3676_v23 }
 0xae2   :  { %2775 = vmatprep.mubr.bf16.mxu0 %v3913_v0  ;;  %v2641_v0 = vld [vmem:[%s4644_s9] sm:$0x3] }
 0xae3   :  { %v4595_v24 = vadd.f32 %v3170_v18, %v2612_v17  ;;  %v2646_v4 = vrot.slane %v2641_v0, %v4091_v43  ;;  %v2650_v5 = vrot.slane %v2641_v0, %v165_v40 }
 0xae4   :  { %3329 = vmatpush3.bf16.msra.mxu1 %v3677_v56 }
 0xae5   :  { %v2624_v29 = vpack.c.bf16 %v4595_v24, %v4597_v11 }
 0xae9   :  { %2776 = vmatmul.mubr.bf16.gmra.mrb[80].mxu0 %v2624_v29 }
 0xbb4   :  { %v2767_v50 = vpop.f32.mrb[76].mxu0 }
 0xbb5   :  { %v2768_v12 = vadd.f32 %v2767_v50, %v2646_v4  ;;  %v2769_v37 = vpop.f32.mrb[77].mxu0 }
 0xbb6   :  { %v2770_v55 = vadd.f32 %v2769_v37, %v2650_v5  ;;  %v2771_v38 = vpop.f32.mrb[78].mxu0 }
 0xbb7   :  { %v2772_v46 = vadd.f32 %v2771_v38, %v2646_v4  ;;  %v2773_v25 = vpop.f32.mrb[79].mxu0  ;;  %v2786_v22 = vmax.f32 %v2768_v12, 0.0 }
 0xbb8   :  { %v2774_v34 = vadd.f32 %v2773_v25, %v2650_v5  ;;  %v2787_v45 = vmax.f32 %v2770_v55, 0.0 }
 0xbb9   :  { %v2788_v9 = vmax.f32 %v2772_v46, 0.0 }
 0xbba   :  { %v2789_v36 = vmax.f32 %v2774_v34, 0.0 }
 0xbbb   :  { %v2794_v41 = vpack.c.bf16 %v2788_v9, %v2786_v22 }
 0xbbc   :  { %v2795_v60 = vpack.c.bf16 %v2789_v36, %v2787_v45  ;;  %v2777_v47 = vpop.f32.mrb[80].mxu0 }
 0xbbd   :  { %v2778_v44 = vadd.f32 %v2777_v47, %v2646_v4  ;;  %v2779_v43 = vpop.f32.mrb[81].mxu0  ;;  %v3204_v47 = vld [vmem:[%s4647_s12] ss:$0 sm:$0xff]  ;;  %s3061_s12 = sshll.u32 %s3919_s29, 4  ;;  %s3062_s12 = int_to_ptr.vmem [resolvable:$true] %s3061_s12 }
 0xbbe   :  { %v2780_v51 = vadd.f32 %v2779_v43, %v2650_v5  ;;  %v2781_v31 = vpop.f32.mrb[82].mxu0  ;;  %2965 = vmatprep.mubr.bf16.mxu1 %v2795_v60  ;;  %p3877_p13 = scmp.lt.s32.totalorder %s3062_s12, %s3062_s12 }
 0xbbf   :  { %v2782_v40 = vadd.f32 %v2781_v31, %v2646_v4  ;;  %v2783_v16 = vpop.f32.mrb[83].mxu0  ;;  %2966 = vmatmul.mubr.bf16.vlgmr.msra.gmra.mrb[68].mxu1 %v2794_v41  ;;  %v2790_v62 = vmax.f32 %v2778_v44, 0.0 }
 0xbc0   :  { %v2784_v20 = vadd.f32 %v2783_v16, %v2650_v5  ;;  %v2791_v52 = vmax.f32 %v2780_v51, 0.0  ;;  %v3205_v51 = vld [vmem:[%s4648_s13] ss:$0 sm:$0xff]  ;;  %s3872_s13 = scalar_lea.vmem %s3062_s12, 512 }
 0xbc1   :  { %v2792_v61 = vmax.f32 %v2782_v40, 0.0  ;;  %p3873_p12 = scmp.ne.s32.totalorder %s3062_s12, %s3872_s13  ;;  %p3878_p0 = scmp.lt.s32.totalorder %s3872_s13, %s3872_s13 }
 0xbc2   :  { %v2793_v6 = vmax.f32 %v2784_v20, 0.0 }
 0xbc3   :  { %v2796_v54 = vpack.c.bf16 %v2792_v61, %v2790_v62  ;;  %p3879_p1 = por %p3878_p0, %p3877_p13 }
 0xbc4   :  { %v2797_v30 = vpack.c.bf16 %v2793_v6, %v2791_v52 }
 0xbc5   :  { %p3880_p2 = pnand %p3879_p1, %p3873_p12 }
 0xbc6   :  { %2973 = vmatprep.mubr.bf16.mxu1 %v2797_v30 }
 0xbc7   :  { %2974 = vmatmul.mubr.bf16.gmra.mrb[72].mxu1 %v2796_v54 }
 0xc92   :  { %v3330_v28 = vpop.f32.mrb[68].mxu1 }
 0xc93   :  { %v3331_v48 = vpop.f32.mrb[69].mxu1 }
 0xc94   :  { %v3332_v27 = vadd.f32 %v3331_v48, %v3330_v28  ;;  %v3333_v35 = vpop.f32.mrb[70].mxu1 }
 0xc95   :  { %v3334_v59 = vpop.f32.mrb[71].mxu1 }
 0xc96   :  { %v2968_v58 = vadd.f32 %v3332_v27, %v3187_v21  ;;  %v3335_v3 = vadd.f32 %v3334_v59, %v3333_v35 }
 0xc98   :  { %v2971_v33 = vadd.f32 %v3335_v3, %v3187_v21  ;;  %v2982_v39 = vadd.f32 %v2968_v58, %v4586_v42 }
 0xc9a   :  { %2988 = vadd.xlane.f32.xlu1 %v2982_v39  ;;  %v3336_v7 = vpop.f32.mrb[72].mxu1  ;;  %v2983_v15 = vadd.f32 %v2971_v33, %v4588_v2 }
 0xc9b   :  { %v3337_v53 = vpop.f32.mrb[73].mxu1 }
 0xc9c   :  { %v3338_v63 = vadd.f32 %v3337_v53, %v3336_v7  ;;  %2990 = vadd.xlane.f32.xlu0 %v2983_v15  ;;  %v3339_v10 = vpop.f32.mrb[74].mxu1 }
 0xc9d   :  { %v3340_v18 = vpop.f32.mrb[75].mxu1 }
 0xc9e   :  { %v2976_v1 = vadd.f32 %v3338_v63, %v3187_v21  ;;  %v3341_v8 = vadd.f32 %v3340_v18, %v3339_v10 }
 0xca0   :  { %v2979_v13 = vadd.f32 %v3341_v8, %v3187_v21  ;;  %v2984_v49 = vadd.f32 %v2976_v1, %v4597_v11 }
 0xca2   :  { %2992 = vadd.xlane.f32.xlu1 %v2984_v49  ;;  %v2985_v57 = vadd.f32 %v2979_v13, %v4595_v24 }
 0xca4   :  { %2994 = vadd.xlane.f32.xlu0 %v2985_v57 }
 0xd27   :  { %v2989_v14 = vpop.xlane.xlu1 %2988 }
 0xd28   :  { %v2996_v42 = vmul.f32 0.0078125, %v2989_v14 }
 0xd29   :  { %v2991_v17 = vpop.xlane.xlu0 %2990 }
 0xd2a   :  { %v3000_v29 = vsub.f32 %v2982_v39, %v2996_v42  ;;  %v2997_v32 = vmul.f32 0.0078125, %v2991_v17 }
 0xd2c   :  { %v3001_v2 = vsub.f32 %v2983_v15, %v2997_v32  ;;  %v3004_v19 = vmul.f32 %v3000_v29, %v3000_v29 }
 0xd2e   :  { %3008 = vadd.xlane.f32.xlu1 %v3004_v19  ;;  %v3005_v26 = vmul.f32 %v3001_v2, %v3001_v2 }
 0xd2f   :  { %v2993_v23 = vpop.xlane.xlu1 %2992 }
 0xd30   :  { %v2998_v56 = vmul.f32 0.0078125, %v2993_v23  ;;  %3010 = vadd.xlane.f32.xlu0 %v3005_v26 }
 0xd31   :  { %v2995_v0 = vpop.xlane.xlu0 %2994 }
 0xd32   :  { %v3002_v4 = vsub.f32 %v2984_v49, %v2998_v56  ;;  %v2999_v5 = vmul.f32 0.0078125, %v2995_v0 }
 0xd34   :  { %v3003_v11 = vsub.f32 %v2985_v57, %v2999_v5  ;;  %v3006_v50 = vmul.f32 %v3002_v4, %v3002_v4 }
 0xd36   :  { %3012 = vadd.xlane.f32.xlu1 %v3006_v50  ;;  %v3007_v24 = vmul.f32 %v3003_v11, %v3003_v11 }
 0xd38   :  { %3014 = vadd.xlane.f32.xlu0 %v3007_v24 }
 0xdbb   :  { %v3009_v12 = vpop.xlane.xlu1 %3008 }
 0xdbc   :  { %v3016_v37 = vmul.f32 0.0078125, %v3009_v12 }
 0xdbd   :  { %v3011_v55 = vpop.xlane.xlu0 %3010 }
 0xdbe   :  { %v3020_v38 = vadd.f32 1e-05, %v3016_v37  ;;  %v3017_v46 = vmul.f32 0.0078125, %v3011_v55 }
 0xdc0   :  { %3752 = vrsqrt.f32 %v3020_v38  ;;  %v3021_v25 = vadd.f32 1e-05, %v3017_v46 }
 0xdc2   :  { %3754 = vrsqrt.f32 %v3021_v25 }
 0xdc3   :  { %v3013_v34 = vpop.xlane.xlu1 %3012 }
 0xdc4   :  { %v3018_v22 = vmul.f32 0.0078125, %v3013_v34 }
 0xdc5   :  { %v3015_v9 = vpop.xlane.xlu0 %3014 }
 0xdc6   :  { %v3022_v45 = vadd.f32 1e-05, %v3018_v22  ;;  %v3019_v36 = vmul.f32 0.0078125, %v3015_v9 }
 0xdc8   :  { %3756 = vrsqrt.f32 %v3022_v45  ;;  %v3023_v41 = vadd.f32 1e-05, %v3019_v36 }
 0xdca   :  { %v3753_v60 = vpop.eup %3752  ;;  %3758 = vrsqrt.f32 %v3023_v41 }
 0xdcb   :  { %v3028_v44 = vmul.f32 %v3753_v60, %v3000_v29 }
 0xdcc   :  { %v3755_v43 = vpop.eup %3754 }
 0xdcd   :  { %v3029_v31 = vmul.f32 %v3755_v43, %v3001_v2  ;;  %v3038_v40 = vmul.f32 %v3204_v47, %v3028_v44 }
 0xdcf   :  { %v3039_v16 = vmul.f32 %v3204_v47, %v3029_v31  ;;  %v3048_v20 = vadd.f32 %v3205_v51, %v3038_v40 }
 0xdd1   :  { %v3049_v62 = vadd.f32 %v3205_v51, %v3039_v16  ;;  %3052 = vst [vmem:[#allocation12] sm:$0xff] %v3048_v20 }
 0xdd2   :  { %v3757_v61 = vpop.eup %3756 }
 0xdd3   :  { %v3030_v52 = vmul.f32 %v3757_v61, %v3002_v4  ;;  %3053 = vst [vmem:[#allocation12 + $0x8] sm:$0xff] %v3049_v62 }
 0xdd4   :  { %v3759_v6 = vpop.eup %3758 }
 0xdd5   :  { %v3031_v54 = vmul.f32 %v3759_v6, %v3003_v11  ;;  %v3040_v30 = vmul.f32 %v3204_v47, %v3030_v52 }
 0xdd7   :  { %v3041_v28 = vmul.f32 %v3204_v47, %v3031_v54  ;;  %v3050_v21 = vadd.f32 %v3205_v51, %v3040_v30 }
 0xdd9   :  { %v3051_v48 = vadd.f32 %v3205_v51, %v3041_v28  ;;  %3054 = vst [vmem:[#allocation12 + $0x10] sm:$0xff] %v3050_v21 }
 0xddb   :  { %3055 = vst [vmem:[#allocation12 + $0x18] sm:$0xff] %v3051_v48 }
 0xddc   :  { %3883 = shalt.err (!%p3880_p2)
}
 0xddd   :  { %s3884_s17 = scalar_lea.hbm %s4649_s14, 512 }
 0xdde   :  { %p3885_p3 = scmp.ne.s32.totalorder %s4649_s14, %s3884_s17  ;;  %p3888_p4 = scmp.lt.u32.totalorder %s3884_s17, %s4649_s14 }
 0xde0   :  { %p3890_p5 = pnand %p3888_p4, %p3885_p3 }
 0xde2   :  { %3893 = shalt.err (!%p3890_p5)
}
 0xde3   :  { %3067 = dma.vmem_to_hbm [thread:$0]  %s3062_s12, 512, %s4649_s14, [#allocation5], %s3906_s2, %s3906_s2, %s3907_s30  }
 0xde4   :  { %3900 = dma.done.wait [#allocation5], 512  }
 0xde5   :  { %3901 = vsyncadd [#allocation5], 4294966784 }
 0xde6   :  { %3071 = vsyncpa [#allocation4], 1 }
 0xde7   :  { %3072 = vsyncpa [#allocation7], 1 }
 0xde8   :  { %3073 = vsyncpa [#allocation10], 1 }
 0xde9   :  { %3074 = vsyncpa [#allocation5], 1 }

</bundles_post_ra>
